<compile_context>
chip_gen: v6e
topology: v6e:2x2x1
jax: 0.10.0
libtpu: 0.0.40
codegen_flags: <defaults>
</compile_context>

<pallas_src>
import jax
import jax.numpy as jnp
import numpy as np
from jax.experimental import pallas as pl
from jax.experimental.pallas import tpu as pltpu


_SIM_COL_TILE = 512   # column block of the similarity matrices kept in flight
                      # (sized for v7x's 64 MiB VMEM; v5e/v6e could use 1024)


# ----------------------- in-kernel math helpers ------------------------------


def _l2_normalize(x, eps=1e-12):
    # F.normalize(p=2, dim=-1): x / max(||x||, eps).  rsqrt keeps the divide on
    # the EUP slot (co-issues with VPU work).
    ss = jnp.sum(x * x, axis=-1, keepdims=True)
    return x * jax.lax.rsqrt(jnp.maximum(ss, eps * eps))


def _infonce_value(z1, z2, inv_t, use_bf16_matmul):
    """InfoNCE loss for one (z1, z2) pair, 2x2 block form, column-streamed.

    With z = [z1n; z2n] (L2-normalized) and s = exp((z z^T - 1) / T):
      neg_i = offdiag-rowsum(s)_i      (the -1/T shift is folded into the exp
                                        and added back after the log, so no
                                        exp(1/T) overflow for small T)
      loss  = mean_{2N} log(neg) + 1/T - mean_N(<z1n, z2n>) / T

    Only the s11, s12, s22 blocks are materialized ([N, col_tile] at a time);
    s21 = s12^T, so its row sums are the column sums of s12 (axis-0 reduce ->
    XLU).  The diagonal is removed by masking the MXU outputs themselves, so
    cancellation is exact (including eps-clamped zero-norm rows and bf16 MXU
    operands).  No transpose / relayout is needed: the z2-half negatives come
    out complete per column block, so their log is reduced immediately.
    """
    n = z1.shape[0]
    z1n = _l2_normalize(z1.astype(jnp.float32))
    z2n = _l2_normalize(z2.astype(jnp.float32))

    # bf16 operands for the MXU; everything else stays f32.
    mxu_dtype = jnp.bfloat16 if use_bf16_matmul else jnp.float32
    a1 = z1n.astype(mxu_dtype)
    a2 = z2n.astype(mxu_dtype)

    def _dot_cols(a, b_cols):       # [N, D] x [tc, D] -> [N, tc] on the MXU
        return jax.lax.dot_general(a, b_cols, (((1,), (1,)), ((), ())),
                                   preferred_element_type=jnp.float32)

    col_tile = min(_SIM_COL_TILE, n)
    neg1 = jnp.zeros((n, 1), jnp.float32)          # z1-half rows (partial sums)
    log_neg2_sum = jnp.float32(0.0)                # z2-half rows (complete per block)

    # Static python loop over column blocks (shapes are static -> no masking
    # of padded columns is ever needed).
    for c0 in range(0, n, col_tile):
        c1 = min(c0 + col_tile, n)
        tc = c1 - c0
        a1c = a1[c0:c1]                                          # [tc, D]
        a2c = a2[c0:c1]
        s11c = jnp.exp((_dot_cols(a1, a1c) - 1.0) * inv_t)       # [N, tc]
        s12c = jnp.exp((_dot_cols(a1, a2c) - 1.0) * inv_t)       # [N, tc]
        s22c = jnp.exp((_dot_cols(a2, a2c) - 1.0) * inv_t)       # [N, tc]

        rows = jax.lax.broadcasted_iota(jnp.int32, (n, tc), 0)
        cols = jax.lax.broadcasted_iota(jnp.int32, (n, tc), 1) + c0
        offd = rows != cols
        s11c = jnp.where(offd, s11c, 0.0)                        # drop diagonal
        s22c = jnp.where(offd, s22c, 0.0)

        # z1-half rows: partial row sums accumulated across column blocks.
        neg1 = neg1 + (jnp.sum(s11c, axis=-1, keepdims=True)
                       + jnp.sum(s12c, axis=-1, keepdims=True))

        # z2-half rows c0:c1: column sums of s12 / s22 are COMPLETE row sums of
        # s21 / s22 for those rows (s21 = s12^T, s22 symmetric) -> log now.
        neg2c = (jnp.sum(s12c, axis=0, keepdims=True)
                 + jnp.sum(s22c, axis=0, keepdims=True))          # [1, tc]
        log_neg2_sum = log_neg2_sum + jnp.sum(jnp.log(neg2c))

    pos_sim = jnp.sum(z1n * z2n, axis=-1, keepdims=True)          # [N, 1], f32
    mean_log_neg = inv_t + (jnp.sum(jnp.log(neg1)) + log_neg2_sum) / (2.0 * n)
    return mean_log_neg - jnp.mean(pos_sim) * inv_t


def _xent_value(logits, labels):
    """Mean cross-entropy: logsumexp - picked logit (one-hot gather via iota)."""
    logits = logits.astype(jnp.float32)               # [B, C]
    b, c = logits.shape
    m = jnp.max(logits, axis=-1, keepdims=True)
    lse = jnp.log(jnp.sum(jnp.exp(logits - m), axis=-1, keepdims=True)) + m
    class_ids = jax.lax.broadcasted_iota(jnp.int32, (b, c), 1)
    onehot = (class_ids == labels).astype(jnp.float32)    # labels: [B, 1] int32
    picked = jnp.sum(logits * onehot, axis=-1, keepdims=True)
    return jnp.mean(lse - picked)


def _entropy_rowsum(logits):
    """Sum over rows of softmax entropy, log-softmax form (no 0*log(0) NaN)."""
    lg = logits.astype(jnp.float32)                    # [M, C]
    m = jnp.max(lg, axis=-1, keepdims=True)
    sh = lg - m
    e = jnp.exp(sh)
    se = jnp.sum(e, axis=-1, keepdims=True)
    p = e / se
    logp = sh - jnp.log(se)
    return -jnp.sum(p * logp)


# ------------------------------ fused kernel ----------------------------------


def _make_fused_kernel(stacked_z, has_src, has_tgt, has_cls, has_heads,
                       head_rows, temperature, use_bf16_matmul):
    inv_t = float(1.0 / temperature)

    def kernel(*refs):
        i = 0
        z1_ref = z2_ref = None
        z1s_ref = z2s_ref = z1t_ref = z2t_ref = None
        if stacked_z:
            z1_ref, z2_ref = refs[i], refs[i + 1]; i += 2
        else:
            if has_src:
                z1s_ref, z2s_ref = refs[i], refs[i + 1]; i += 2
            if has_tgt:
                z1t_ref, z2t_ref = refs[i], refs[i + 1]; i += 2
        if has_cls:
            logits_ref, labels_ref = refs[i], refs[i + 1]; i += 2
        if has_heads:
            heads_ref = refs[i]; i += 1
        out_ref = refs[i]

        pid = pl.program_id(0)
        lane = jax.lax.broadcasted_iota(jnp.int32, (8, 128), 1)

        # program 0: source-domain InfoNCE + classification cross-entropy
        @pl.when(pid == 0)
        def _():
            if stacked_z or has_src:
                zr1 = z1_ref if stacked_z else z1s_ref
                zr2 = z2_ref if stacked_z else z2s_ref
                c = _infonce_value(zr1[...], zr2[...], inv_t, use_bf16_matmul)
            else:
                c = jnp.float32(0.0)
            cl = (_xent_value(logits_ref[...], labels_ref[...])
                  if has_cls else jnp.float32(0.0))
            out_ref[...] = (jnp.where(lane == 0, c, 0.0)
                            + jnp.where(lane == 1, cl, 0.0))

        # program 1: target-domain InfoNCE + entropy minimization over heads
        @pl.when(pid == 1)
        def _():
            if stacked_z or has_tgt:
                zr1 = z1_ref if stacked_z else z1t_ref
                zr2 = z2_ref if stacked_z else z2t_ref
                c = _infonce_value(zr1[...], zr2[...], inv_t, use_bf16_matmul)
            else:
                c = jnp.float32(0.0)
            ent = ((_entropy_rowsum(heads_ref[...]) / float(head_rows))
                   if has_heads else jnp.float32(0.0))
            out_ref[...] = (jnp.where(lane == 0, c, 0.0)
                            + jnp.where(lane == 2, ent, 0.0))

    return kernel


# -------------------------------- wrapper --------------------------------------


def _vmem_limit_bytes(inputs, z_rows, z_cols):
    """Size the scoped VMEM limit from the actual live set (+headroom)."""
    in_bytes = sum(int(x.size) * x.dtype.itemsize for x in inputs) * 2  # 2 bufs
    col = min(_SIM_COL_TILE, max(z_rows, 1))
    sim_bytes = 3 * z_rows * col * 4                 # s11/s12/s22 column blocks
    work_bytes = 8 * z_rows * max(z_cols, 1) * 4     # f32/bf16 copies, temporaries
    est = in_bytes + sim_bytes + work_bytes + 16 * 128 * 4
    return int(min(max(2 * est, 16 * 1024 * 1024), 64 * 1024 * 1024))


def fused_domain_da_losses(z1_src, z2_src, z1_tgt, z2_tgt, logits0, labels,
                           extra_heads, temperature, use_bf16_matmul=True):
    """One pallas_call returning (contrast_loss, cls_loss, entropy_loss)."""
    has_src = (z1_src is not None) and (z2_src is not None)
    has_tgt = (z1_tgt is not None) and (z2_tgt is not None)
    has_cls = (labels is not None) and (logits0 is not None)
    heads = list(extra_heads)
    has_heads = len(heads) > 0

    zero = jnp.float32(0.0)
    if not (has_src or has_tgt or has_cls or has_heads):
        return zero, zero, zero

    stacked_z = (has_src and has_tgt
                 and z1_src.shape == z1_tgt.shape and z2_src.shape == z2_tgt.shape
                 and z1_src.dtype == z1_tgt.dtype and z2_src.dtype == z2_tgt.dtype)

    inputs = []
    spec_descs = []   # (block_shape, index_map, grid_invariant)

    def _const_map(nd):
        return lambda g, _nd=nd: (0,) * _nd

    def _add_invariant(x):
        inputs.append(x)
        spec_descs.append((x.shape, _const_map(x.ndim), True))

    if stacked_z:
        # Program-local DMA: TensorCore g only pulls the domain it computes on.
        z1s = jnp.stack([z1_src, z1_tgt], axis=0)            # [2, N, D]
        z2s = jnp.stack([z2_src, z2_tgt], axis=0)
        zmap = lambda g: (g, 0, 0)
        inputs.append(z1s)
        spec_descs.append(((pl.Squeezed(),) + z1_src.shape, zmap, False))
        inputs.append(z2s)
        spec_descs.append(((pl.Squeezed(),) + z2_src.shape, zmap, False))
    else:
        if has_src:
            _add_invariant(z1_src); _add_invariant(z2_src)
        if has_tgt:
            _add_invariant(z1_tgt); _add_invariant(z2_tgt)

    if has_cls:
        _add_invariant(logits0)
        _add_invariant(jnp.asarray(labels).astype(jnp.int32).reshape(-1, 1))

    head_rows = 0
    if has_heads:
        heads_cat = heads[0] if len(heads) == 1 else jnp.concatenate(heads, axis=0)
        head_rows = heads_cat.shape[0]
        _add_invariant(heads_cat)

    kernel = _make_fused_kernel(stacked_z, has_src, has_tgt, has_cls, has_heads,
                                head_rows, float(temperature), use_bf16_matmul)

    z_rows = z_cols = 0
    for z in (z1_src, z2_src, z1_tgt, z2_tgt):
        if z is not None:
            z_rows = max(z_rows, z.shape[0])
            z_cols = max(z_cols, z.shape[1])
    vmem_limit = _vmem_limit_bytes(inputs, z_rows, z_cols)

    def _build_specs(single_buffer):
        specs = []
        for shape, idx, invariant in spec_descs:
            if single_buffer and invariant:
                # Grid-invariant block: default double-buffering just doubles
                # VMEM for nothing.
                specs.append(pl.BlockSpec(shape, idx, pipeline_mode=pl.Buffered(1)))
            else:
                specs.append(pl.BlockSpec(shape, idx))
        return specs

    out = None
    last_err = None
    # Prefer single-buffered grid-invariant inputs; fall back for Pallas builds
    # without top-level pipeline_mode support (keeps the script runnable).
    for single_buffer in (True, False):
        try:
            out = pl.pallas_call(
                kernel,
                out_shape=jax.ShapeDtypeStruct((16, 128), jnp.float32),
                grid=(2,),
                in_specs=_build_specs(single_buffer),
                out_specs=pl.BlockSpec((8, 128), lambda g: (g, 0)),
                compiler_params=pltpu.CompilerParams(
                    dimension_semantics=("parallel",),
                    vmem_limit_bytes=vmem_limit),
            )(*inputs)
            out = jax.block_until_ready(out)
            break
        except Exception as e:     # pragma: no cover - version fallback
            last_err = e
            out = None
    if out is None:
        raise last_err

    contrast_loss = out[0, 0] + out[8, 0]
    cls_loss = out[0, 1] if has_cls else zero
    ent_loss = out[8, 2] if has_heads else zero
    return contrast_loss, cls_loss, ent_loss


# --------------------------------- forward ------------------------------------


def forward(z1_src, z2_src, z1_tgt, z2_tgt, logits, labels,
            weight=1.0, temperature=0.5):
    """Mirrors domain_aware_contrastive_da_loss_with_entropy_minimization.forward.

    `logits` is a tuple/list of [B, C] arrays; `labels` is [B] int.
    Returns (total, contrast_loss, cls_loss, entropy_loss, y_entropy).
    """
    # TODO(synk): args.temperature_scheduler is external state; modeled as a fixed temperature arg.
    logits = list(logits) if isinstance(logits, (list, tuple)) else [logits]
    logits0 = logits[0] if len(logits) > 0 else None
    contrast_loss, cls_loss, ent_loss = fused_domain_da_losses(
        z1_src, z2_src, z1_tgt, z2_tgt, logits0, labels, logits[1:], temperature)

    y_entropy = jnp.float32(0.0)
    total = cls_loss + weight * contrast_loss + ent_loss
    return total, contrast_loss, cls_loss, ent_loss, y_entropy


# ----------------------------- pure-JAX reference ------------------------------


def _reference(z1_src, z2_src, z1_tgt, z2_tgt, logits, labels, weight, temperature):
    def l2n(x):
        nrm = jnp.maximum(jnp.sqrt(jnp.sum(x * x, -1, keepdims=True)), 1e-12)
        return x / nrm

    def infonce(z1, z2):
        z1n, z2n = l2n(z1), l2n(z2)
        z = jnp.concatenate([z1n, z2n], 0)
        ns = z.shape[0]
        cov = jnp.matmul(z, z.T, precision=jax.lax.Precision.HIGHEST)
        sim = jnp.exp(cov / temperature)
        neg = jnp.sum(sim * (1.0 - jnp.eye(ns)), -1)
        pos = jnp.exp(jnp.sum(z1n * z2n, -1) / temperature)
        pos = jnp.concatenate([pos, pos], 0)
        return -jnp.mean(jnp.log(pos / neg))

    def xent(lg, lb):
        logp = jax.nn.log_softmax(lg, -1)
        return -jnp.mean(jnp.take_along_axis(logp, lb[:, None], -1))

    def entropy(lg):
        p = jax.nn.softmax(lg, -1)
        logp = jax.nn.log_softmax(lg, -1)
        return -jnp.mean(jnp.sum(p * logp, -1))

    cls = xent(logits[0], labels)
    con = infonce(z1_src, z2_src) + infonce(z1_tgt, z2_tgt)
    ent = entropy(jnp.concatenate(list(logits[1:]), 0))
    total = cls + weight * con + ent
    return total, con, cls, ent, jnp.float32(0.0)


# ----------------------------------- demo --------------------------------------

if __name__ == "__main__":
    key = jax.random.PRNGKey(0)
    k1, k2, k3, k4, k5, k6, k7, k8 = jax.random.split(key, 8)

    N, D = 8, 32     # contrastive embeddings: [N, D]
    B, C = 8, 4      # classification logits:  [B, C]

    z1_src = jax.random.normal(k1, (N, D), jnp.float32)
    z2_src = jax.random.normal(k2, (N, D), jnp.float32)
    z1_tgt = jax.random.normal(k3, (N, D), jnp.float32)
    z2_tgt = jax.random.normal(k4, (N, D), jnp.float32)

    logits0 = jax.random.normal(k5, (B, C), jnp.float32)   # source logits (cls loss)
    logits1 = jax.random.normal(k6, (B, C), jnp.float32)   # target logits (entropy min.)
    logits2 = jax.random.normal(k7, (B, C), jnp.float32)
    labels = jax.random.randint(k8, (B,), 0, C, jnp.int32)

    temperature = 0.5
    weight = 1.0

    out = forward(z1_src, z2_src, z1_tgt, z2_tgt,
                  (logits0, logits1, logits2), labels,
                  weight=weight, temperature=temperature)
    out = jax.block_until_ready(out)

    ref = _reference(z1_src, z2_src, z1_tgt, z2_tgt,
                     (logits0, logits1, logits2), labels, weight, temperature)

    got = np.array([float(v) for v in out])
    exp = np.array([float(v) for v in ref])
    assert np.all(np.isfinite(got))
    # bf16 MXU operands introduce ~1e-3 absolute error in the cosine matrix,
    # absorbed by the tolerances below (reference uses f32 HIGHEST).
    np.testing.assert_allclose(got, exp, rtol=5e-3, atol=2e-3)
    print("KERNEL_OK")
</pallas_src>

<mosaic_0001>
module attributes {stable_mosaic.version = 11 : i64} {
  func.func @kernel(%arg0: i32, %arg1: memref<1x8x32xf32, #tpu.memory_space<vmem>>, %arg2: memref<1x8x32xf32, #tpu.memory_space<vmem>>, %arg3: memref<8x4xf32, #tpu.memory_space<vmem>>, %arg4: memref<8x1xi32, #tpu.memory_space<vmem>>, %arg5: memref<16x4xf32, #tpu.memory_space<vmem>>, %arg6: memref<8x128xf32, #tpu.memory_space<vmem>>) attributes {dimension_semantics = [#tpu.dimension_semantics<parallel>], iteration_bounds = array<i64: 2>, scalar_prefetch = 0 : i64, scratch_operands = 0 : i64, tpu.core_type = #tpu.core_type<tc>, window_params = [{transform_indices = @transform_0, window_bounds = array<i64: 1, 8, 32>}, {transform_indices = @transform_1, window_bounds = array<i64: 1, 8, 32>}, {pipeline_mode = #tpu.pipeline_mode<synchronous>, transform_indices = @transform_2, window_bounds = array<i64: 8, 4>}, {pipeline_mode = #tpu.pipeline_mode<synchronous>, transform_indices = @transform_3, window_bounds = array<i64: 8, 1>}, {pipeline_mode = #tpu.pipeline_mode<synchronous>, transform_indices = @transform_4, window_bounds = array<i64: 16, 4>}, {transform_indices = @transform_5, window_bounds = array<i64: 8, 128>}]} {
    %0 = tpu.iota {dimensions = array<i32: 1>} : vector<8x128xi32>
    %c0_i32 = arith.constant 0 : i32
    %1 = arith.cmpi eq, %arg0, %c0_i32 : i32
    %2 = arith.extui %1 : i1 to i32
    %c0_i32_0 = arith.constant 0 : i32
    %3 = arith.cmpi ne, %2, %c0_i32_0 : i32
    scf.if %3 {
      %c0 = arith.constant 0 : index
      %c0_2 = arith.constant 0 : index
      %c0_3 = arith.constant 0 : index
      %7 = vector.load %arg1[%c0, %c0_2, %c0_3] : memref<1x8x32xf32, #tpu.memory_space<vmem>>, vector<1x8x32xf32>
      %8 = vector.shape_cast %7 : vector<1x8x32xf32> to vector<8x32xf32>
      %c0_4 = arith.constant 0 : index
      %c0_5 = arith.constant 0 : index
      %c0_6 = arith.constant 0 : index
      %9 = vector.load %arg2[%c0_4, %c0_5, %c0_6] : memref<1x8x32xf32, #tpu.memory_space<vmem>>, vector<1x8x32xf32>
      %10 = vector.shape_cast %9 : vector<1x8x32xf32> to vector<8x32xf32>
      %11 = arith.mulf %8, %8 : vector<8x32xf32>
      %cst = arith.constant dense<0.000000e+00> : vector<8xf32>
      %12 = vector.multi_reduction <add>, %11, %cst [1] : vector<8x32xf32> to vector<8xf32>
      %13 = vector.shape_cast %12 : vector<8xf32> to vector<8x1xf32>
      %cst_7 = arith.constant 1.000000e-24 : f32
      %14 = vector.broadcast %cst_7 : f32 to vector<8x1xf32>
      %15 = arith.maximumf %13, %14 : vector<8x1xf32>
      %16 = math.rsqrt %15 : vector<8x1xf32>
      %17 = vector.broadcast %16 : vector<8x1xf32> to vector<8x32xf32>
      %18 = arith.mulf %8, %17 : vector<8x32xf32>
      %19 = arith.mulf %10, %10 : vector<8x32xf32>
      %cst_8 = arith.constant dense<0.000000e+00> : vector<8xf32>
      %20 = vector.multi_reduction <add>, %19, %cst_8 [1] : vector<8x32xf32> to vector<8xf32>
      %21 = vector.shape_cast %20 : vector<8xf32> to vector<8x1xf32>
      %cst_9 = arith.constant 1.000000e-24 : f32
      %22 = vector.broadcast %cst_9 : f32 to vector<8x1xf32>
      %23 = arith.maximumf %21, %22 : vector<8x1xf32>
      %24 = math.rsqrt %23 : vector<8x1xf32>
      %25 = vector.broadcast %24 : vector<8x1xf32> to vector<8x32xf32>
      %26 = arith.mulf %10, %25 : vector<8x32xf32>
      %27 = arith.truncf %18 : vector<8x32xf32> to vector<8x32xbf16>
      %28 = arith.truncf %26 : vector<8x32xf32> to vector<8x32xbf16>
      %cst_10 = arith.constant 0.000000e+00 : f32
      %29 = vector.broadcast %cst_10 : f32 to vector<8x1xf32>
      %cst_11 = arith.constant dense<0.000000e+00> : vector<8x8xf32>
      %30 = tpu.matmul %27, %27, %cst_11 {dimension_numbers = #tpu.dot_dimension_numbers<[1], [1], [0], [0], [0, 0, 1, 0], [], []>} : vector<8x32xbf16>, vector<8x32xbf16>, vector<8x8xf32> -> vector<8x8xf32>
      %cst_12 = arith.constant 1.000000e+00 : f32
      %31 = vector.broadcast %cst_12 : f32 to vector<8x8xf32>
      %32 = arith.subf %30, %31 : vector<8x8xf32>
      %cst_13 = arith.constant 2.000000e+00 : f32
      %33 = vector.broadcast %cst_13 : f32 to vector<8x8xf32>
      %34 = arith.mulf %32, %33 : vector<8x8xf32>
      %35 = math.exp %34 : vector<8x8xf32>
      %cst_14 = arith.constant dense<0.000000e+00> : vector<8x8xf32>
      %36 = tpu.matmul %27, %28, %cst_14 {dimension_numbers = #tpu.dot_dimension_numbers<[1], [1], [0], [0], [0, 0, 1, 0], [], []>} : vector<8x32xbf16>, vector<8x32xbf16>, vector<8x8xf32> -> vector<8x8xf32>
      %cst_15 = arith.constant 1.000000e+00 : f32
      %37 = vector.broadcast %cst_15 : f32 to vector<8x8xf32>
      %38 = arith.subf %36, %37 : vector<8x8xf32>
      %cst_16 = arith.constant 2.000000e+00 : f32
      %39 = vector.broadcast %cst_16 : f32 to vector<8x8xf32>
      %40 = arith.mulf %38, %39 : vector<8x8xf32>
      %41 = math.exp %40 : vector<8x8xf32>
      %cst_17 = arith.constant dense<0.000000e+00> : vector<8x8xf32>
      %42 = tpu.matmul %28, %28, %cst_17 {dimension_numbers = #tpu.dot_dimension_numbers<[1], [1], [0], [0], [0, 0, 1, 0], [], []>} : vector<8x32xbf16>, vector<8x32xbf16>, vector<8x8xf32> -> vector<8x8xf32>
      %cst_18 = arith.constant 1.000000e+00 : f32
      %43 = vector.broadcast %cst_18 : f32 to vector<8x8xf32>
      %44 = arith.subf %42, %43 : vector<8x8xf32>
      %cst_19 = arith.constant 2.000000e+00 : f32
      %45 = vector.broadcast %cst_19 : f32 to vector<8x8xf32>
      %46 = arith.mulf %44, %45 : vector<8x8xf32>
      %47 = math.exp %46 : vector<8x8xf32>
      %48 = tpu.iota {dimensions = array<i32: 0>} : vector<8x8xi32>
      %49 = tpu.iota {dimensions = array<i32: 1>} : vector<8x8xi32>
      %c0_i32_20 = arith.constant 0 : i32
      %50 = vector.broadcast %c0_i32_20 : i32 to vector<8x8xi32>
      %51 = arith.addi %49, %50 : vector<8x8xi32>
      %52 = arith.cmpi ne, %48, %51 : vector<8x8xi32>
      %cst_21 = arith.constant 0.000000e+00 : f32
      %53 = vector.broadcast %cst_21 : f32 to vector<8x8xf32>
      %54 = arith.select %52, %35, %53 : vector<8x8xi1>, vector<8x8xf32>
      %cst_22 = arith.constant 0.000000e+00 : f32
      %55 = vector.broadcast %cst_22 : f32 to vector<8x8xf32>
      %56 = arith.select %52, %47, %55 : vector<8x8xi1>, vector<8x8xf32>
      %cst_23 = arith.constant dense<0.000000e+00> : vector<8xf32>
      %57 = vector.multi_reduction <add>, %54, %cst_23 [1] : vector<8x8xf32> to vector<8xf32>
      %58 = vector.shape_cast %57 : vector<8xf32> to vector<8x1xf32>
      %cst_24 = arith.constant dense<0.000000e+00> : vector<8xf32>
      %59 = vector.multi_reduction <add>, %41, %cst_24 [1] : vector<8x8xf32> to vector<8xf32>
      %60 = vector.shape_cast %59 : vector<8xf32> to vector<8x1xf32>
      %61 = arith.addf %58, %60 : vector<8x1xf32>
      %62 = arith.addf %29, %61 : vector<8x1xf32>
      %cst_25 = arith.constant dense<0.000000e+00> : vector<8xf32>
      %63 = vector.multi_reduction <add>, %41, %cst_25 [0] : vector<8x8xf32> to vector<8xf32>
      %64 = vector.shape_cast %63 : vector<8xf32> to vector<1x8xf32>
      %cst_26 = arith.constant dense<0.000000e+00> : vector<8xf32>
      %65 = vector.multi_reduction <add>, %56, %cst_26 [0] : vector<8x8xf32> to vector<8xf32>
      %66 = vector.shape_cast %65 : vector<8xf32> to vector<1x8xf32>
      %67 = arith.addf %64, %66 : vector<1x8xf32>
      %68 = math.log %67 : vector<1x8xf32>
      %69 = vector.shape_cast %68 : vector<1x8xf32> to vector<1x1x8xf32>
      %cst_27 = arith.constant dense<0.000000e+00> : vector<1xf32>
      %70 = vector.multi_reduction <add>, %69, %cst_27 [1, 2] : vector<1x1x8xf32> to vector<1xf32>
      %71 = vector.shape_cast %70 : vector<1xf32> to vector<1x1x1xf32>
      %72 = vector.extract %71[0, 0, 0] : f32 from vector<1x1x1xf32>
      %cst_28 = arith.constant 0.000000e+00 : f32
      %73 = arith.addf %cst_28, %72 : f32
      %74 = arith.mulf %18, %26 : vector<8x32xf32>
      %cst_29 = arith.constant dense<0.000000e+00> : vector<8xf32>
      %75 = vector.multi_reduction <add>, %74, %cst_29 [1] : vector<8x32xf32> to vector<8xf32>
      %76 = vector.shape_cast %75 : vector<8xf32> to vector<8x1xf32>
      %77 = math.log %62 : vector<8x1xf32>
      %78 = vector.shape_cast %77 : vector<8x1xf32> to vector<1x8x1xf32>
      %cst_30 = arith.constant dense<0.000000e+00> : vector<1xf32>
      %79 = vector.multi_reduction <add>, %78, %cst_30 [1, 2] : vector<1x8x1xf32> to vector<1xf32>
      %80 = vector.shape_cast %79 : vector<1xf32> to vector<1x1x1xf32>
      %81 = vector.extract %80[0, 0, 0] : f32 from vector<1x1x1xf32>
      %82 = arith.addf %81, %73 : f32
      %cst_31 = arith.constant 1.600000e+01 : f32
      %83 = arith.divf %82, %cst_31 : f32
      %cst_32 = arith.constant 2.000000e+00 : f32
      %84 = arith.addf %cst_32, %83 : f32
      %85 = vector.shape_cast %76 : vector<8x1xf32> to vector<1x8x1xf32>
      %cst_33 = arith.constant dense<0.000000e+00> : vector<1xf32>
      %86 = vector.multi_reduction <add>, %85, %cst_33 [1, 2] : vector<1x8x1xf32> to vector<1xf32>
      %87 = vector.shape_cast %86 : vector<1xf32> to vector<1x1x1xf32>
      %88 = vector.extract %87[0, 0, 0] : f32 from vector<1x1x1xf32>
      %cst_34 = arith.constant 8.000000e+00 : f32
      %89 = arith.divf %88, %cst_34 : f32
      %cst_35 = arith.constant 2.000000e+00 : f32
      %90 = arith.mulf %89, %cst_35 : f32
      %91 = arith.subf %84, %90 : f32
      %c0_36 = arith.constant 0 : index
      %c0_37 = arith.constant 0 : index
      %92 = vector.load %arg3[%c0_36, %c0_37] : memref<8x4xf32, #tpu.memory_space<vmem>>, vector<8x4xf32>
      %c0_38 = arith.constant 0 : index
      %c0_39 = arith.constant 0 : index
      %93 = vector.load %arg4[%c0_38, %c0_39] : memref<8x1xi32, #tpu.memory_space<vmem>>, vector<8x1xi32>
      %cst_40 = arith.constant dense<0xFF800000> : vector<8xf32>
      %94 = vector.multi_reduction <maximumf>, %92, %cst_40 [1] : vector<8x4xf32> to vector<8xf32>
      %95 = vector.shape_cast %94 : vector<8xf32> to vector<8x1xf32>
      %96 = vector.broadcast %95 : vector<8x1xf32> to vector<8x4xf32>
      %97 = arith.subf %92, %96 : vector<8x4xf32>
      %98 = math.exp %97 : vector<8x4xf32>
      %cst_41 = arith.constant dense<0.000000e+00> : vector<8xf32>
      %99 = vector.multi_reduction <add>, %98, %cst_41 [1] : vector<8x4xf32> to vector<8xf32>
      %100 = vector.shape_cast %99 : vector<8xf32> to vector<8x1xf32>
      %101 = math.log %100 : vector<8x1xf32>
      %102 = arith.addf %101, %95 : vector<8x1xf32>
      %103 = tpu.iota {dimensions = array<i32: 1>} : vector<8x4xi32>
      %104 = vector.broadcast %93 : vector<8x1xi32> to vector<8x4xi32>
      %105 = arith.cmpi eq, %103, %104 : vector<8x4xi32>
      %106 = arith.extui %105 : vector<8x4xi1> to vector<8x4xi32>
      %107 = arith.sitofp %106 : vector<8x4xi32> to vector<8x4xf32>
      %108 = arith.mulf %92, %107 : vector<8x4xf32>
      %cst_42 = arith.constant dense<0.000000e+00> : vector<8xf32>
      %109 = vector.multi_reduction <add>, %108, %cst_42 [1] : vector<8x4xf32> to vector<8xf32>
      %110 = vector.shape_cast %109 : vector<8xf32> to vector<8x1xf32>
      %111 = arith.subf %102, %110 : vector<8x1xf32>
      %112 = vector.shape_cast %111 : vector<8x1xf32> to vector<1x8x1xf32>
      %cst_43 = arith.constant dense<0.000000e+00> : vector<1xf32>
      %113 = vector.multi_reduction <add>, %112, %cst_43 [1, 2] : vector<1x8x1xf32> to vector<1xf32>
      %114 = vector.shape_cast %113 : vector<1xf32> to vector<1x1x1xf32>
      %115 = vector.extract %114[0, 0, 0] : f32 from vector<1x1x1xf32>
      %cst_44 = arith.constant 8.000000e+00 : f32
      %116 = arith.divf %115, %cst_44 : f32
      %c0_i32_45 = arith.constant 0 : i32
      %117 = vector.broadcast %c0_i32_45 : i32 to vector<8x128xi32>
      %118 = arith.cmpi eq, %0, %117 : vector<8x128xi32>
      %cst_46 = arith.constant 0.000000e+00 : f32
      %119 = vector.broadcast %91 : f32 to vector<8x128xf32>
      %120 = vector.broadcast %cst_46 : f32 to vector<8x128xf32>
      %121 = arith.select %118, %119, %120 : vector<8x128xi1>, vector<8x128xf32>
      %c1_i32_47 = arith.constant 1 : i32
      %122 = vector.broadcast %c1_i32_47 : i32 to vector<8x128xi32>
      %123 = arith.cmpi eq, %0, %122 : vector<8x128xi32>
      %cst_48 = arith.constant 0.000000e+00 : f32
      %124 = vector.broadcast %116 : f32 to vector<8x128xf32>
      %125 = vector.broadcast %cst_48 : f32 to vector<8x128xf32>
      %126 = arith.select %123, %124, %125 : vector<8x128xi1>, vector<8x128xf32>
      %127 = arith.addf %121, %126 : vector<8x128xf32>
      %c0_49 = arith.constant 0 : index
      %c0_50 = arith.constant 0 : index
      %128 = vector.load %arg6[%c0_49, %c0_50] : memref<8x128xf32, #tpu.memory_space<vmem>>, vector<8x128xf32>
      tpu.vector_store %arg6[%c0_49, %c0_50], %127 {strides = array<i32>} : memref<8x128xf32, #tpu.memory_space<vmem>>, vector<8x128xf32>,
    } else {
    }
    %c1_i32 = arith.constant 1 : i32
    %4 = arith.cmpi eq, %arg0, %c1_i32 : i32
    %5 = arith.extui %4 : i1 to i32
    %c0_i32_1 = arith.constant 0 : i32
    %6 = arith.cmpi ne, %5, %c0_i32_1 : i32
    scf.if %6 {
      %c0 = arith.constant 0 : index
      %c0_2 = arith.constant 0 : index
      %c0_3 = arith.constant 0 : index
      %7 = vector.load %arg1[%c0, %c0_2, %c0_3] : memref<1x8x32xf32, #tpu.memory_space<vmem>>, vector<1x8x32xf32>
      %8 = vector.shape_cast %7 : vector<1x8x32xf32> to vector<8x32xf32>
      %c0_4 = arith.constant 0 : index
      %c0_5 = arith.constant 0 : index
      %c0_6 = arith.constant 0 : index
      %9 = vector.load %arg2[%c0_4, %c0_5, %c0_6] : memref<1x8x32xf32, #tpu.memory_space<vmem>>, vector<1x8x32xf32>
      %10 = vector.shape_cast %9 : vector<1x8x32xf32> to vector<8x32xf32>
      %11 = arith.mulf %8, %8 : vector<8x32xf32>
      %cst = arith.constant dense<0.000000e+00> : vector<8xf32>
      %12 = vector.multi_reduction <add>, %11, %cst [1] : vector<8x32xf32> to vector<8xf32>
      %13 = vector.shape_cast %12 : vector<8xf32> to vector<8x1xf32>
      %cst_7 = arith.constant 1.000000e-24 : f32
      %14 = vector.broadcast %cst_7 : f32 to vector<8x1xf32>
      %15 = arith.maximumf %13, %14 : vector<8x1xf32>
      %16 = math.rsqrt %15 : vector<8x1xf32>
      %17 = vector.broadcast %16 : vector<8x1xf32> to vector<8x32xf32>
      %18 = arith.mulf %8, %17 : vector<8x32xf32>
      %19 = arith.mulf %10, %10 : vector<8x32xf32>
      %cst_8 = arith.constant dense<0.000000e+00> : vector<8xf32>
      %20 = vector.multi_reduction <add>, %19, %cst_8 [1] : vector<8x32xf32> to vector<8xf32>
      %21 = vector.shape_cast %20 : vector<8xf32> to vector<8x1xf32>
      %cst_9 = arith.constant 1.000000e-24 : f32
      %22 = vector.broadcast %cst_9 : f32 to vector<8x1xf32>
      %23 = arith.maximumf %21, %22 : vector<8x1xf32>
      %24 = math.rsqrt %23 : vector<8x1xf32>
      %25 = vector.broadcast %24 : vector<8x1xf32> to vector<8x32xf32>
      %26 = arith.mulf %10, %25 : vector<8x32xf32>
      %27 = arith.truncf %18 : vector<8x32xf32> to vector<8x32xbf16>
      %28 = arith.truncf %26 : vector<8x32xf32> to vector<8x32xbf16>
      %cst_10 = arith.constant 0.000000e+00 : f32
      %29 = vector.broadcast %cst_10 : f32 to vector<8x1xf32>
      %cst_11 = arith.constant dense<0.000000e+00> : vector<8x8xf32>
      %30 = tpu.matmul %27, %27, %cst_11 {dimension_numbers = #tpu.dot_dimension_numbers<[1], [1], [0], [0], [0, 0, 1, 0], [], []>} : vector<8x32xbf16>, vector<8x32xbf16>, vector<8x8xf32> -> vector<8x8xf32>
      %cst_12 = arith.constant 1.000000e+00 : f32
      %31 = vector.broadcast %cst_12 : f32 to vector<8x8xf32>
      %32 = arith.subf %30, %31 : vector<8x8xf32>
      %cst_13 = arith.constant 2.000000e+00 : f32
      %33 = vector.broadcast %cst_13 : f32 to vector<8x8xf32>
      %34 = arith.mulf %32, %33 : vector<8x8xf32>
      %35 = math.exp %34 : vector<8x8xf32>
      %cst_14 = arith.constant dense<0.000000e+00> : vector<8x8xf32>
      %36 = tpu.matmul %27, %28, %cst_14 {dimension_numbers = #tpu.dot_dimension_numbers<[1], [1], [0], [0], [0, 0, 1, 0], [], []>} : vector<8x32xbf16>, vector<8x32xbf16>, vector<8x8xf32> -> vector<8x8xf32>
      %cst_15 = arith.constant 1.000000e+00 : f32
      %37 = vector.broadcast %cst_15 : f32 to vector<8x8xf32>
      %38 = arith.subf %36, %37 : vector<8x8xf32>
      %cst_16 = arith.constant 2.000000e+00 : f32
      %39 = vector.broadcast %cst_16 : f32 to vector<8x8xf32>
      %40 = arith.mulf %38, %39 : vector<8x8xf32>
      %41 = math.exp %40 : vector<8x8xf32>
      %cst_17 = arith.constant dense<0.000000e+00> : vector<8x8xf32>
      %42 = tpu.matmul %28, %28, %cst_17 {dimension_numbers = #tpu.dot_dimension_numbers<[1], [1], [0], [0], [0, 0, 1, 0], [], []>} : vector<8x32xbf16>, vector<8x32xbf16>, vector<8x8xf32> -> vector<8x8xf32>
      %cst_18 = arith.constant 1.000000e+00 : f32
      %43 = vector.broadcast %cst_18 : f32 to vector<8x8xf32>
      %44 = arith.subf %42, %43 : vector<8x8xf32>
      %cst_19 = arith.constant 2.000000e+00 : f32
      %45 = vector.broadcast %cst_19 : f32 to vector<8x8xf32>
      %46 = arith.mulf %44, %45 : vector<8x8xf32>
      %47 = math.exp %46 : vector<8x8xf32>
      %48 = tpu.iota {dimensions = array<i32: 0>} : vector<8x8xi32>
      %49 = tpu.iota {dimensions = array<i32: 1>} : vector<8x8xi32>
      %c0_i32_20 = arith.constant 0 : i32
      %50 = vector.broadcast %c0_i32_20 : i32 to vector<8x8xi32>
      %51 = arith.addi %49, %50 : vector<8x8xi32>
      %52 = arith.cmpi ne, %48, %51 : vector<8x8xi32>
      %cst_21 = arith.constant 0.000000e+00 : f32
      %53 = vector.broadcast %cst_21 : f32 to vector<8x8xf32>
      %54 = arith.select %52, %35, %53 : vector<8x8xi1>, vector<8x8xf32>
      %cst_22 = arith.constant 0.000000e+00 : f32
      %55 = vector.broadcast %cst_22 : f32 to vector<8x8xf32>
      %56 = arith.select %52, %47, %55 : vector<8x8xi1>, vector<8x8xf32>
      %cst_23 = arith.constant dense<0.000000e+00> : vector<8xf32>
      %57 = vector.multi_reduction <add>, %54, %cst_23 [1] : vector<8x8xf32> to vector<8xf32>
      %58 = vector.shape_cast %57 : vector<8xf32> to vector<8x1xf32>
      %cst_24 = arith.constant dense<0.000000e+00> : vector<8xf32>
      %59 = vector.multi_reduction <add>, %41, %cst_24 [1] : vector<8x8xf32> to vector<8xf32>
      %60 = vector.shape_cast %59 : vector<8xf32> to vector<8x1xf32>
      %61 = arith.addf %58, %60 : vector<8x1xf32>
      %62 = arith.addf %29, %61 : vector<8x1xf32>
      %cst_25 = arith.constant dense<0.000000e+00> : vector<8xf32>
      %63 = vector.multi_reduction <add>, %41, %cst_25 [0] : vector<8x8xf32> to vector<8xf32>
      %64 = vector.shape_cast %63 : vector<8xf32> to vector<1x8xf32>
      %cst_26 = arith.constant dense<0.000000e+00> : vector<8xf32>
      %65 = vector.multi_reduction <add>, %56, %cst_26 [0] : vector<8x8xf32> to vector<8xf32>
      %66 = vector.shape_cast %65 : vector<8xf32> to vector<1x8xf32>
      %67 = arith.addf %64, %66 : vector<1x8xf32>
      %68 = math.log %67 : vector<1x8xf32>
      %69 = vector.shape_cast %68 : vector<1x8xf32> to vector<1x1x8xf32>
      %cst_27 = arith.constant dense<0.000000e+00> : vector<1xf32>
      %70 = vector.multi_reduction <add>, %69, %cst_27 [1, 2] : vector<1x1x8xf32> to vector<1xf32>
      %71 = vector.shape_cast %70 : vector<1xf32> to vector<1x1x1xf32>
      %72 = vector.extract %71[0, 0, 0] : f32 from vector<1x1x1xf32>
      %cst_28 = arith.constant 0.000000e+00 : f32
      %73 = arith.addf %cst_28, %72 : f32
      %74 = arith.mulf %18, %26 : vector<8x32xf32>
      %cst_29 = arith.constant dense<0.000000e+00> : vector<8xf32>
      %75 = vector.multi_reduction <add>, %74, %cst_29 [1] : vector<8x32xf32> to vector<8xf32>
      %76 = vector.shape_cast %75 : vector<8xf32> to vector<8x1xf32>
      %77 = math.log %62 : vector<8x1xf32>
      %78 = vector.shape_cast %77 : vector<8x1xf32> to vector<1x8x1xf32>
      %cst_30 = arith.constant dense<0.000000e+00> : vector<1xf32>
      %79 = vector.multi_reduction <add>, %78, %cst_30 [1, 2] : vector<1x8x1xf32> to vector<1xf32>
      %80 = vector.shape_cast %79 : vector<1xf32> to vector<1x1x1xf32>
      %81 = vector.extract %80[0, 0, 0] : f32 from vector<1x1x1xf32>
      %82 = arith.addf %81, %73 : f32
      %cst_31 = arith.constant 1.600000e+01 : f32
      %83 = arith.divf %82, %cst_31 : f32
      %cst_32 = arith.constant 2.000000e+00 : f32
      %84 = arith.addf %cst_32, %83 : f32
      %85 = vector.shape_cast %76 : vector<8x1xf32> to vector<1x8x1xf32>
      %cst_33 = arith.constant dense<0.000000e+00> : vector<1xf32>
      %86 = vector.multi_reduction <add>, %85, %cst_33 [1, 2] : vector<1x8x1xf32> to vector<1xf32>
      %87 = vector.shape_cast %86 : vector<1xf32> to vector<1x1x1xf32>
      %88 = vector.extract %87[0, 0, 0] : f32 from vector<1x1x1xf32>
      %cst_34 = arith.constant 8.000000e+00 : f32
      %89 = arith.divf %88, %cst_34 : f32
      %cst_35 = arith.constant 2.000000e+00 : f32
      %90 = arith.mulf %89, %cst_35 : f32
      %91 = arith.subf %84, %90 : f32
      %c0_36 = arith.constant 0 : index
      %c0_37 = arith.constant 0 : index
      %92 = vector.load %arg5[%c0_36, %c0_37] : memref<16x4xf32, #tpu.memory_space<vmem>>, vector<16x4xf32>
      %cst_38 = arith.constant dense<0xFF800000> : vector<16xf32>
      %93 = vector.multi_reduction <maximumf>, %92, %cst_38 [1] : vector<16x4xf32> to vector<16xf32>
      %94 = vector.shape_cast %93 : vector<16xf32> to vector<16x1xf32>
      %95 = vector.broadcast %94 : vector<16x1xf32> to vector<16x4xf32>
      %96 = arith.subf %92, %95 : vector<16x4xf32>
      %97 = math.exp %96 : vector<16x4xf32>
      %cst_39 = arith.constant dense<0.000000e+00> : vector<16xf32>
      %98 = vector.multi_reduction <add>, %97, %cst_39 [1] : vector<16x4xf32> to vector<16xf32>
      %99 = vector.shape_cast %98 : vector<16xf32> to vector<16x1xf32>
      %100 = vector.broadcast %99 : vector<16x1xf32> to vector<16x4xf32>
      %101 = arith.divf %97, %100 : vector<16x4xf32>
      %102 = math.log %99 : vector<16x1xf32>
      %103 = vector.broadcast %102 : vector<16x1xf32> to vector<16x4xf32>
      %104 = arith.subf %96, %103 : vector<16x4xf32>
      %105 = arith.mulf %101, %104 : vector<16x4xf32>
      %106 = vector.shape_cast %105 : vector<16x4xf32> to vector<1x16x4xf32>
      %cst_40 = arith.constant dense<0.000000e+00> : vector<1xf32>
      %107 = vector.multi_reduction <add>, %106, %cst_40 [1, 2] : vector<1x16x4xf32> to vector<1xf32>
      %108 = vector.shape_cast %107 : vector<1xf32> to vector<1x1x1xf32>
      %109 = vector.extract %108[0, 0, 0] : f32 from vector<1x1x1xf32>
      %cst_41 = arith.constant 0.000000e+00 : f32
      %110 = arith.subf %cst_41, %109 : f32
      %cst_42 = arith.constant 1.600000e+01 : f32
      %111 = arith.divf %110, %cst_42 : f32
      %c0_i32_43 = arith.constant 0 : i32
      %112 = vector.broadcast %c0_i32_43 : i32 to vector<8x128xi32>
      %113 = arith.cmpi eq, %0, %112 : vector<8x128xi32>
      %cst_44 = arith.constant 0.000000e+00 : f32
      %114 = vector.broadcast %91 : f32 to vector<8x128xf32>
      %115 = vector.broadcast %cst_44 : f32 to vector<8x128xf32>
      %116 = arith.select %113, %114, %115 : vector<8x128xi1>, vector<8x128xf32>
      %c2_i32 = arith.constant 2 : i32
      %117 = vector.broadcast %c2_i32 : i32 to vector<8x128xi32>
      %118 = arith.cmpi eq, %0, %117 : vector<8x128xi32>
      %cst_45 = arith.constant 0.000000e+00 : f32
      %119 = vector.broadcast %111 : f32 to vector<8x128xf32>
      %120 = vector.broadcast %cst_45 : f32 to vector<8x128xf32>
      %121 = arith.select %118, %119, %120 : vector<8x128xi1>, vector<8x128xf32>
      %122 = arith.addf %116, %121 : vector<8x128xf32>
      %c0_46 = arith.constant 0 : index
      %c0_47 = arith.constant 0 : index
      %123 = vector.load %arg6[%c0_46, %c0_47] : memref<8x128xf32, #tpu.memory_space<vmem>>, vector<8x128xf32>
      tpu.vector_store %arg6[%c0_46, %c0_47], %122 {strides = array<i32>} : memref<8x128xf32, #tpu.memory_space<vmem>>, vector<8x128xf32>,
    } else {
    }
    return
  }
  func.func @transform_0(%arg0: i32) -> (i32, i32, i32) {
    %c0_i32 = arith.constant 0 : i32
    %c0_i32_0 = arith.constant 0 : i32
    %c0_i32_1 = arith.constant 0 : i32
    return %arg0, %c0_i32, %c0_i32_0 : i32, i32, i32
  }
  func.func @transform_1(%arg0: i32) -> (i32, i32, i32) {
    %c0_i32 = arith.constant 0 : i32
    %c0_i32_0 = arith.constant 0 : i32
    %c0_i32_1 = arith.constant 0 : i32
    return %arg0, %c0_i32, %c0_i32_0 : i32, i32, i32
  }
  func.func @transform_2(%arg0: i32) -> (i32, i32) {
    %c0_i32 = arith.constant 0 : i32
    %c0_i32_0 = arith.constant 0 : i32
    %c0_i32_1 = arith.constant 0 : i32
    return %c0_i32, %c0_i32_0 : i32, i32
  }
  func.func @transform_3(%arg0: i32) -> (i32, i32) {
    %c0_i32 = arith.constant 0 : i32
    %c0_i32_0 = arith.constant 0 : i32
    %c0_i32_1 = arith.constant 0 : i32
    return %c0_i32, %c0_i32_0 : i32, i32
  }
  func.func @transform_4(%arg0: i32) -> (i32, i32) {
    %c0_i32 = arith.constant 0 : i32
    %c0_i32_0 = arith.constant 0 : i32
    %c0_i32_1 = arith.constant 0 : i32
    return %c0_i32, %c0_i32_0 : i32, i32
  }
  func.func @transform_5(%arg0: i32) -> (i32, i32) {
    %c0_i32 = arith.constant 0 : i32
    %c0_i32_0 = arith.constant 0 : i32
    return %arg0, %c0_i32 : i32, i32
  }
}

module attributes {stable_mosaic.version = 11 : i64} {
  func.func @kernel(%arg0: i32, %arg1: memref<1x8x32xf32, #tpu.memory_space<vmem>>, %arg2: memref<1x8x32xf32, #tpu.memory_space<vmem>>, %arg3: memref<8x4xf32, #tpu.memory_space<vmem>>, %arg4: memref<8x1xi32, #tpu.memory_space<vmem>>, %arg5: memref<16x4xf32, #tpu.memory_space<vmem>>, %arg6: memref<8x128xf32, #tpu.memory_space<vmem>>) attributes {dimension_semantics = [#tpu.dimension_semantics<parallel>], iteration_bounds = array<i64: 2>, scalar_prefetch = 0 : i64, scratch_operands = 0 : i64, tpu.core_type = #tpu.core_type<tc>, window_params = [{transform_indices = @transform_0, window_bounds = array<i64: 1, 8, 32>}, {transform_indices = @transform_1, window_bounds = array<i64: 1, 8, 32>}, {pipeline_mode = #tpu.pipeline_mode<synchronous>, transform_indices = @transform_2, window_bounds = array<i64: 8, 4>}, {pipeline_mode = #tpu.pipeline_mode<synchronous>, transform_indices = @transform_3, window_bounds = array<i64: 8, 1>}, {pipeline_mode = #tpu.pipeline_mode<synchronous>, transform_indices = @transform_4, window_bounds = array<i64: 16, 4>}, {transform_indices = @transform_5, window_bounds = array<i64: 8, 128>}]} {
    %0 = tpu.iota {dimensions = array<i32: 1>} : vector<8x128xi32>
    %c0_i32 = arith.constant 0 : i32
    %1 = arith.cmpi eq, %arg0, %c0_i32 : i32
    %2 = arith.extui %1 : i1 to i32
    %c0_i32_0 = arith.constant 0 : i32
    %3 = arith.cmpi ne, %2, %c0_i32_0 : i32
    scf.if %3 {
      %c0 = arith.constant 0 : index
      %c0_2 = arith.constant 0 : index
      %c0_3 = arith.constant 0 : index
      %7 = vector.load %arg1[%c0, %c0_2, %c0_3] : memref<1x8x32xf32, #tpu.memory_space<vmem>>, vector<1x8x32xf32>
      %8 = vector.shape_cast %7 : vector<1x8x32xf32> to vector<8x32xf32>
      %c0_4 = arith.constant 0 : index
      %c0_5 = arith.constant 0 : index
      %c0_6 = arith.constant 0 : index
      %9 = vector.load %arg2[%c0_4, %c0_5, %c0_6] : memref<1x8x32xf32, #tpu.memory_space<vmem>>, vector<1x8x32xf32>
      %10 = vector.shape_cast %9 : vector<1x8x32xf32> to vector<8x32xf32>
      %11 = arith.mulf %8, %8 : vector<8x32xf32>
      %cst = arith.constant dense<0.000000e+00> : vector<8xf32>
      %12 = vector.multi_reduction <add>, %11, %cst [1] : vector<8x32xf32> to vector<8xf32>
      %13 = vector.shape_cast %12 : vector<8xf32> to vector<8x1xf32>
      %cst_7 = arith.constant 1.000000e-24 : f32
      %14 = vector.broadcast %cst_7 : f32 to vector<8x1xf32>
      %15 = arith.maximumf %13, %14 : vector<8x1xf32>
      %16 = math.rsqrt %15 : vector<8x1xf32>
      %17 = vector.broadcast %16 : vector<8x1xf32> to vector<8x32xf32>
      %18 = arith.mulf %8, %17 : vector<8x32xf32>
      %19 = arith.mulf %10, %10 : vector<8x32xf32>
      %cst_8 = arith.constant dense<0.000000e+00> : vector<8xf32>
      %20 = vector.multi_reduction <add>, %19, %cst_8 [1] : vector<8x32xf32> to vector<8xf32>
      %21 = vector.shape_cast %20 : vector<8xf32> to vector<8x1xf32>
      %cst_9 = arith.constant 1.000000e-24 : f32
      %22 = vector.broadcast %cst_9 : f32 to vector<8x1xf32>
      %23 = arith.maximumf %21, %22 : vector<8x1xf32>
      %24 = math.rsqrt %23 : vector<8x1xf32>
      %25 = vector.broadcast %24 : vector<8x1xf32> to vector<8x32xf32>
      %26 = arith.mulf %10, %25 : vector<8x32xf32>
      %27 = arith.truncf %18 : vector<8x32xf32> to vector<8x32xbf16>
      %28 = arith.truncf %26 : vector<8x32xf32> to vector<8x32xbf16>
      %cst_10 = arith.constant 0.000000e+00 : f32
      %29 = vector.broadcast %cst_10 : f32 to vector<8x1xf32>
      %cst_11 = arith.constant dense<0.000000e+00> : vector<8x8xf32>
      %30 = tpu.matmul %27, %27, %cst_11 {dimension_numbers = #tpu.dot_dimension_numbers<[1], [1], [0], [0], [0, 0, 1, 0], [], []>} : vector<8x32xbf16>, vector<8x32xbf16>, vector<8x8xf32> -> vector<8x8xf32>
      %cst_12 = arith.constant 1.000000e+00 : f32
      %31 = vector.broadcast %cst_12 : f32 to vector<8x8xf32>
      %32 = arith.subf %30, %31 : vector<8x8xf32>
      %cst_13 = arith.constant 2.000000e+00 : f32
      %33 = vector.broadcast %cst_13 : f32 to vector<8x8xf32>
      %34 = arith.mulf %32, %33 : vector<8x8xf32>
      %35 = math.exp %34 : vector<8x8xf32>
      %cst_14 = arith.constant dense<0.000000e+00> : vector<8x8xf32>
      %36 = tpu.matmul %27, %28, %cst_14 {dimension_numbers = #tpu.dot_dimension_numbers<[1], [1], [0], [0], [0, 0, 1, 0], [], []>} : vector<8x32xbf16>, vector<8x32xbf16>, vector<8x8xf32> -> vector<8x8xf32>
      %cst_15 = arith.constant 1.000000e+00 : f32
      %37 = vector.broadcast %cst_15 : f32 to vector<8x8xf32>
      %38 = arith.subf %36, %37 : vector<8x8xf32>
      %cst_16 = arith.constant 2.000000e+00 : f32
      %39 = vector.broadcast %cst_16 : f32 to vector<8x8xf32>
      %40 = arith.mulf %38, %39 : vector<8x8xf32>
      %41 = math.exp %40 : vector<8x8xf32>
      %cst_17 = arith.constant dense<0.000000e+00> : vector<8x8xf32>
      %42 = tpu.matmul %28, %28, %cst_17 {dimension_numbers = #tpu.dot_dimension_numbers<[1], [1], [0], [0], [0, 0, 1, 0], [], []>} : vector<8x32xbf16>, vector<8x32xbf16>, vector<8x8xf32> -> vector<8x8xf32>
      %cst_18 = arith.constant 1.000000e+00 : f32
      %43 = vector.broadcast %cst_18 : f32 to vector<8x8xf32>
      %44 = arith.subf %42, %43 : vector<8x8xf32>
      %cst_19 = arith.constant 2.000000e+00 : f32
      %45 = vector.broadcast %cst_19 : f32 to vector<8x8xf32>
      %46 = arith.mulf %44, %45 : vector<8x8xf32>
      %47 = math.exp %46 : vector<8x8xf32>
      %48 = tpu.iota {dimensions = array<i32: 0>} : vector<8x8xi32>
      %49 = tpu.iota {dimensions = array<i32: 1>} : vector<8x8xi32>
      %c0_i32_20 = arith.constant 0 : i32
      %50 = vector.broadcast %c0_i32_20 : i32 to vector<8x8xi32>
      %51 = arith.addi %49, %50 : vector<8x8xi32>
      %52 = arith.cmpi ne, %48, %51 : vector<8x8xi32>
      %cst_21 = arith.constant 0.000000e+00 : f32
      %53 = vector.broadcast %cst_21 : f32 to vector<8x8xf32>
      %54 = arith.select %52, %35, %53 : vector<8x8xi1>, vector<8x8xf32>
      %cst_22 = arith.constant 0.000000e+00 : f32
      %55 = vector.broadcast %cst_22 : f32 to vector<8x8xf32>
      %56 = arith.select %52, %47, %55 : vector<8x8xi1>, vector<8x8xf32>
      %cst_23 = arith.constant dense<0.000000e+00> : vector<8xf32>
      %57 = vector.multi_reduction <add>, %54, %cst_23 [1] : vector<8x8xf32> to vector<8xf32>
      %58 = vector.shape_cast %57 : vector<8xf32> to vector<8x1xf32>
      %cst_24 = arith.constant dense<0.000000e+00> : vector<8xf32>
      %59 = vector.multi_reduction <add>, %41, %cst_24 [1] : vector<8x8xf32> to vector<8xf32>
      %60 = vector.shape_cast %59 : vector<8xf32> to vector<8x1xf32>
      %61 = arith.addf %58, %60 : vector<8x1xf32>
      %62 = arith.addf %29, %61 : vector<8x1xf32>
      %cst_25 = arith.constant dense<0.000000e+00> : vector<8xf32>
      %63 = vector.multi_reduction <add>, %41, %cst_25 [0] : vector<8x8xf32> to vector<8xf32>
      %64 = vector.shape_cast %63 : vector<8xf32> to vector<1x8xf32>
      %cst_26 = arith.constant dense<0.000000e+00> : vector<8xf32>
      %65 = vector.multi_reduction <add>, %56, %cst_26 [0] : vector<8x8xf32> to vector<8xf32>
      %66 = vector.shape_cast %65 : vector<8xf32> to vector<1x8xf32>
      %67 = arith.addf %64, %66 : vector<1x8xf32>
      %68 = math.log %67 : vector<1x8xf32>
      %69 = vector.shape_cast %68 : vector<1x8xf32> to vector<1x1x8xf32>
      %cst_27 = arith.constant dense<0.000000e+00> : vector<1xf32>
      %70 = vector.multi_reduction <add>, %69, %cst_27 [1, 2] : vector<1x1x8xf32> to vector<1xf32>
      %71 = vector.shape_cast %70 : vector<1xf32> to vector<1x1x1xf32>
      %72 = vector.extract %71[0, 0, 0] : f32 from vector<1x1x1xf32>
      %cst_28 = arith.constant 0.000000e+00 : f32
      %73 = arith.addf %cst_28, %72 : f32
      %74 = arith.mulf %18, %26 : vector<8x32xf32>
      %cst_29 = arith.constant dense<0.000000e+00> : vector<8xf32>
      %75 = vector.multi_reduction <add>, %74, %cst_29 [1] : vector<8x32xf32> to vector<8xf32>
      %76 = vector.shape_cast %75 : vector<8xf32> to vector<8x1xf32>
      %77 = math.log %62 : vector<8x1xf32>
      %78 = vector.shape_cast %77 : vector<8x1xf32> to vector<1x8x1xf32>
      %cst_30 = arith.constant dense<0.000000e+00> : vector<1xf32>
      %79 = vector.multi_reduction <add>, %78, %cst_30 [1, 2] : vector<1x8x1xf32> to vector<1xf32>
      %80 = vector.shape_cast %79 : vector<1xf32> to vector<1x1x1xf32>
      %81 = vector.extract %80[0, 0, 0] : f32 from vector<1x1x1xf32>
      %82 = arith.addf %81, %73 : f32
      %cst_31 = arith.constant 1.600000e+01 : f32
      %83 = arith.divf %82, %cst_31 : f32
      %cst_32 = arith.constant 2.000000e+00 : f32
      %84 = arith.addf %cst_32, %83 : f32
      %85 = vector.shape_cast %76 : vector<8x1xf32> to vector<1x8x1xf32>
      %cst_33 = arith.constant dense<0.000000e+00> : vector<1xf32>
      %86 = vector.multi_reduction <add>, %85, %cst_33 [1, 2] : vector<1x8x1xf32> to vector<1xf32>
      %87 = vector.shape_cast %86 : vector<1xf32> to vector<1x1x1xf32>
      %88 = vector.extract %87[0, 0, 0] : f32 from vector<1x1x1xf32>
      %cst_34 = arith.constant 8.000000e+00 : f32
      %89 = arith.divf %88, %cst_34 : f32
      %cst_35 = arith.constant 2.000000e+00 : f32
      %90 = arith.mulf %89, %cst_35 : f32
      %91 = arith.subf %84, %90 : f32
      %c0_36 = arith.constant 0 : index
      %c0_37 = arith.constant 0 : index
      %92 = vector.load %arg3[%c0_36, %c0_37] : memref<8x4xf32, #tpu.memory_space<vmem>>, vector<8x4xf32>
      %c0_38 = arith.constant 0 : index
      %c0_39 = arith.constant 0 : index
      %93 = vector.load %arg4[%c0_38, %c0_39] : memref<8x1xi32, #tpu.memory_space<vmem>>, vector<8x1xi32>
      %cst_40 = arith.constant dense<0xFF800000> : vector<8xf32>
      %94 = vector.multi_reduction <maximumf>, %92, %cst_40 [1] : vector<8x4xf32> to vector<8xf32>
      %95 = vector.shape_cast %94 : vector<8xf32> to vector<8x1xf32>
      %96 = vector.broadcast %95 : vector<8x1xf32> to vector<8x4xf32>
      %97 = arith.subf %92, %96 : vector<8x4xf32>
      %98 = math.exp %97 : vector<8x4xf32>
      %cst_41 = arith.constant dense<0.000000e+00> : vector<8xf32>
      %99 = vector.multi_reduction <add>, %98, %cst_41 [1] : vector<8x4xf32> to vector<8xf32>
      %100 = vector.shape_cast %99 : vector<8xf32> to vector<8x1xf32>
      %101 = math.log %100 : vector<8x1xf32>
      %102 = arith.addf %101, %95 : vector<8x1xf32>
      %103 = tpu.iota {dimensions = array<i32: 1>} : vector<8x4xi32>
      %104 = vector.broadcast %93 : vector<8x1xi32> to vector<8x4xi32>
      %105 = arith.cmpi eq, %103, %104 : vector<8x4xi32>
      %106 = arith.extui %105 : vector<8x4xi1> to vector<8x4xi32>
      %107 = arith.sitofp %106 : vector<8x4xi32> to vector<8x4xf32>
      %108 = arith.mulf %92, %107 : vector<8x4xf32>
      %cst_42 = arith.constant dense<0.000000e+00> : vector<8xf32>
      %109 = vector.multi_reduction <add>, %108, %cst_42 [1] : vector<8x4xf32> to vector<8xf32>
      %110 = vector.shape_cast %109 : vector<8xf32> to vector<8x1xf32>
      %111 = arith.subf %102, %110 : vector<8x1xf32>
      %112 = vector.shape_cast %111 : vector<8x1xf32> to vector<1x8x1xf32>
      %cst_43 = arith.constant dense<0.000000e+00> : vector<1xf32>
      %113 = vector.multi_reduction <add>, %112, %cst_43 [1, 2] : vector<1x8x1xf32> to vector<1xf32>
      %114 = vector.shape_cast %113 : vector<1xf32> to vector<1x1x1xf32>
      %115 = vector.extract %114[0, 0, 0] : f32 from vector<1x1x1xf32>
      %cst_44 = arith.constant 8.000000e+00 : f32
      %116 = arith.divf %115, %cst_44 : f32
      %c0_i32_45 = arith.constant 0 : i32
      %117 = vector.broadcast %c0_i32_45 : i32 to vector<8x128xi32>
      %118 = arith.cmpi eq, %0, %117 : vector<8x128xi32>
      %cst_46 = arith.constant 0.000000e+00 : f32
      %119 = vector.broadcast %91 : f32 to vector<8x128xf32>
      %120 = vector.broadcast %cst_46 : f32 to vector<8x128xf32>
      %121 = arith.select %118, %119, %120 : vector<8x128xi1>, vector<8x128xf32>
      %c1_i32_47 = arith.constant 1 : i32
      %122 = vector.broadcast %c1_i32_47 : i32 to vector<8x128xi32>
      %123 = arith.cmpi eq, %0, %122 : vector<8x128xi32>
      %cst_48 = arith.constant 0.000000e+00 : f32
      %124 = vector.broadcast %116 : f32 to vector<8x128xf32>
      %125 = vector.broadcast %cst_48 : f32 to vector<8x128xf32>
      %126 = arith.select %123, %124, %125 : vector<8x128xi1>, vector<8x128xf32>
      %127 = arith.addf %121, %126 : vector<8x128xf32>
      %c0_49 = arith.constant 0 : index
      %c0_50 = arith.constant 0 : index
      %128 = vector.load %arg6[%c0_49, %c0_50] : memref<8x128xf32, #tpu.memory_space<vmem>>, vector<8x128xf32>
      tpu.vector_store %arg6[%c0_49, %c0_50], %127 {strides = array<i32>} : memref<8x128xf32, #tpu.memory_space<vmem>>, vector<8x128xf32>,
    } else {
    }
    %c1_i32 = arith.constant 1 : i32
    %4 = arith.cmpi eq, %arg0, %c1_i32 : i32
    %5 = arith.extui %4 : i1 to i32
    %c0_i32_1 = arith.constant 0 : i32
    %6 = arith.cmpi ne, %5, %c0_i32_1 : i32
    scf.if %6 {
      %c0 = arith.constant 0 : index
      %c0_2 = arith.constant 0 : index
      %c0_3 = arith.constant 0 : index
      %7 = vector.load %arg1[%c0, %c0_2, %c0_3] : memref<1x8x32xf32, #tpu.memory_space<vmem>>, vector<1x8x32xf32>
      %8 = vector.shape_cast %7 : vector<1x8x32xf32> to vector<8x32xf32>
      %c0_4 = arith.constant 0 : index
      %c0_5 = arith.constant 0 : index
      %c0_6 = arith.constant 0 : index
      %9 = vector.load %arg2[%c0_4, %c0_5, %c0_6] : memref<1x8x32xf32, #tpu.memory_space<vmem>>, vector<1x8x32xf32>
      %10 = vector.shape_cast %9 : vector<1x8x32xf32> to vector<8x32xf32>
      %11 = arith.mulf %8, %8 : vector<8x32xf32>
      %cst = arith.constant dense<0.000000e+00> : vector<8xf32>
      %12 = vector.multi_reduction <add>, %11, %cst [1] : vector<8x32xf32> to vector<8xf32>
      %13 = vector.shape_cast %12 : vector<8xf32> to vector<8x1xf32>
      %cst_7 = arith.constant 1.000000e-24 : f32
      %14 = vector.broadcast %cst_7 : f32 to vector<8x1xf32>
      %15 = arith.maximumf %13, %14 : vector<8x1xf32>
      %16 = math.rsqrt %15 : vector<8x1xf32>
      %17 = vector.broadcast %16 : vector<8x1xf32> to vector<8x32xf32>
      %18 = arith.mulf %8, %17 : vector<8x32xf32>
      %19 = arith.mulf %10, %10 : vector<8x32xf32>
      %cst_8 = arith.constant dense<0.000000e+00> : vector<8xf32>
      %20 = vector.multi_reduction <add>, %19, %cst_8 [1] : vector<8x32xf32> to vector<8xf32>
      %21 = vector.shape_cast %20 : vector<8xf32> to vector<8x1xf32>
      %cst_9 = arith.constant 1.000000e-24 : f32
      %22 = vector.broadcast %cst_9 : f32 to vector<8x1xf32>
      %23 = arith.maximumf %21, %22 : vector<8x1xf32>
      %24 = math.rsqrt %23 : vector<8x1xf32>
      %25 = vector.broadcast %24 : vector<8x1xf32> to vector<8x32xf32>
      %26 = arith.mulf %10, %25 : vector<8x32xf32>
      %27 = arith.truncf %18 : vector<8x32xf32> to vector<8x32xbf16>
      %28 = arith.truncf %26 : vector<8x32xf32> to vector<8x32xbf16>
      %cst_10 = arith.constant 0.000000e+00 : f32
      %29 = vector.broadcast %cst_10 : f32 to vector<8x1xf32>
      %cst_11 = arith.constant dense<0.000000e+00> : vector<8x8xf32>
      %30 = tpu.matmul %27, %27, %cst_11 {dimension_numbers = #tpu.dot_dimension_numbers<[1], [1], [0], [0], [0, 0, 1, 0], [], []>} : vector<8x32xbf16>, vector<8x32xbf16>, vector<8x8xf32> -> vector<8x8xf32>
      %cst_12 = arith.constant 1.000000e+00 : f32
      %31 = vector.broadcast %cst_12 : f32 to vector<8x8xf32>
      %32 = arith.subf %30, %31 : vector<8x8xf32>
      %cst_13 = arith.constant 2.000000e+00 : f32
      %33 = vector.broadcast %cst_13 : f32 to vector<8x8xf32>
      %34 = arith.mulf %32, %33 : vector<8x8xf32>
      %35 = math.exp %34 : vector<8x8xf32>
      %cst_14 = arith.constant dense<0.000000e+00> : vector<8x8xf32>
      %36 = tpu.matmul %27, %28, %cst_14 {dimension_numbers = #tpu.dot_dimension_numbers<[1], [1], [0], [0], [0, 0, 1, 0], [], []>} : vector<8x32xbf16>, vector<8x32xbf16>, vector<8x8xf32> -> vector<8x8xf32>
      %cst_15 = arith.constant 1.000000e+00 : f32
      %37 = vector.broadcast %cst_15 : f32 to vector<8x8xf32>
      %38 = arith.subf %36, %37 : vector<8x8xf32>
      %cst_16 = arith.constant 2.000000e+00 : f32
      %39 = vector.broadcast %cst_16 : f32 to vector<8x8xf32>
      %40 = arith.mulf %38, %39 : vector<8x8xf32>
      %41 = math.exp %40 : vector<8x8xf32>
      %cst_17 = arith.constant dense<0.000000e+00> : vector<8x8xf32>
      %42 = tpu.matmul %28, %28, %cst_17 {dimension_numbers = #tpu.dot_dimension_numbers<[1], [1], [0], [0], [0, 0, 1, 0], [], []>} : vector<8x32xbf16>, vector<8x32xbf16>, vector<8x8xf32> -> vector<8x8xf32>
      %cst_18 = arith.constant 1.000000e+00 : f32
      %43 = vector.broadcast %cst_18 : f32 to vector<8x8xf32>
      %44 = arith.subf %42, %43 : vector<8x8xf32>
      %cst_19 = arith.constant 2.000000e+00 : f32
      %45 = vector.broadcast %cst_19 : f32 to vector<8x8xf32>
      %46 = arith.mulf %44, %45 : vector<8x8xf32>
      %47 = math.exp %46 : vector<8x8xf32>
      %48 = tpu.iota {dimensions = array<i32: 0>} : vector<8x8xi32>
      %49 = tpu.iota {dimensions = array<i32: 1>} : vector<8x8xi32>
      %c0_i32_20 = arith.constant 0 : i32
      %50 = vector.broadcast %c0_i32_20 : i32 to vector<8x8xi32>
      %51 = arith.addi %49, %50 : vector<8x8xi32>
      %52 = arith.cmpi ne, %48, %51 : vector<8x8xi32>
      %cst_21 = arith.constant 0.000000e+00 : f32
      %53 = vector.broadcast %cst_21 : f32 to vector<8x8xf32>
      %54 = arith.select %52, %35, %53 : vector<8x8xi1>, vector<8x8xf32>
      %cst_22 = arith.constant 0.000000e+00 : f32
      %55 = vector.broadcast %cst_22 : f32 to vector<8x8xf32>
      %56 = arith.select %52, %47, %55 : vector<8x8xi1>, vector<8x8xf32>
      %cst_23 = arith.constant dense<0.000000e+00> : vector<8xf32>
      %57 = vector.multi_reduction <add>, %54, %cst_23 [1] : vector<8x8xf32> to vector<8xf32>
      %58 = vector.shape_cast %57 : vector<8xf32> to vector<8x1xf32>
      %cst_24 = arith.constant dense<0.000000e+00> : vector<8xf32>
      %59 = vector.multi_reduction <add>, %41, %cst_24 [1] : vector<8x8xf32> to vector<8xf32>
      %60 = vector.shape_cast %59 : vector<8xf32> to vector<8x1xf32>
      %61 = arith.addf %58, %60 : vector<8x1xf32>
      %62 = arith.addf %29, %61 : vector<8x1xf32>
      %cst_25 = arith.constant dense<0.000000e+00> : vector<8xf32>
      %63 = vector.multi_reduction <add>, %41, %cst_25 [0] : vector<8x8xf32> to vector<8xf32>
      %64 = vector.shape_cast %63 : vector<8xf32> to vector<1x8xf32>
      %cst_26 = arith.constant dense<0.000000e+00> : vector<8xf32>
      %65 = vector.multi_reduction <add>, %56, %cst_26 [0] : vector<8x8xf32> to vector<8xf32>
      %66 = vector.shape_cast %65 : vector<8xf32> to vector<1x8xf32>
      %67 = arith.addf %64, %66 : vector<1x8xf32>
      %68 = math.log %67 : vector<1x8xf32>
      %69 = vector.shape_cast %68 : vector<1x8xf32> to vector<1x1x8xf32>
      %cst_27 = arith.constant dense<0.000000e+00> : vector<1xf32>
      %70 = vector.multi_reduction <add>, %69, %cst_27 [1, 2] : vector<1x1x8xf32> to vector<1xf32>
      %71 = vector.shape_cast %70 : vector<1xf32> to vector<1x1x1xf32>
      %72 = vector.extract %71[0, 0, 0] : f32 from vector<1x1x1xf32>
      %cst_28 = arith.constant 0.000000e+00 : f32
      %73 = arith.addf %cst_28, %72 : f32
      %74 = arith.mulf %18, %26 : vector<8x32xf32>
      %cst_29 = arith.constant dense<0.000000e+00> : vector<8xf32>
      %75 = vector.multi_reduction <add>, %74, %cst_29 [1] : vector<8x32xf32> to vector<8xf32>
      %76 = vector.shape_cast %75 : vector<8xf32> to vector<8x1xf32>
      %77 = math.log %62 : vector<8x1xf32>
      %78 = vector.shape_cast %77 : vector<8x1xf32> to vector<1x8x1xf32>
      %cst_30 = arith.constant dense<0.000000e+00> : vector<1xf32>
      %79 = vector.multi_reduction <add>, %78, %cst_30 [1, 2] : vector<1x8x1xf32> to vector<1xf32>
      %80 = vector.shape_cast %79 : vector<1xf32> to vector<1x1x1xf32>
      %81 = vector.extract %80[0, 0, 0] : f32 from vector<1x1x1xf32>
      %82 = arith.addf %81, %73 : f32
      %cst_31 = arith.constant 1.600000e+01 : f32
      %83 = arith.divf %82, %cst_31 : f32
      %cst_32 = arith.constant 2.000000e+00 : f32
      %84 = arith.addf %cst_32, %83 : f32
      %85 = vector.shape_cast %76 : vector<8x1xf32> to vector<1x8x1xf32>
      %cst_33 = arith.constant dense<0.000000e+00> : vector<1xf32>
      %86 = vector.multi_reduction <add>, %85, %cst_33 [1, 2] : vector<1x8x1xf32> to vector<1xf32>
      %87 = vector.shape_cast %86 : vector<1xf32> to vector<1x1x1xf32>
      %88 = vector.extract %87[0, 0, 0] : f32 from vector<1x1x1xf32>
      %cst_34 = arith.constant 8.000000e+00 : f32
      %89 = arith.divf %88, %cst_34 : f32
      %cst_35 = arith.constant 2.000000e+00 : f32
      %90 = arith.mulf %89, %cst_35 : f32
      %91 = arith.subf %84, %90 : f32
      %c0_36 = arith.constant 0 : index
      %c0_37 = arith.constant 0 : index
      %92 = vector.load %arg5[%c0_36, %c0_37] : memref<16x4xf32, #tpu.memory_space<vmem>>, vector<16x4xf32>
      %cst_38 = arith.constant dense<0xFF800000> : vector<16xf32>
      %93 = vector.multi_reduction <maximumf>, %92, %cst_38 [1] : vector<16x4xf32> to vector<16xf32>
      %94 = vector.shape_cast %93 : vector<16xf32> to vector<16x1xf32>
      %95 = vector.broadcast %94 : vector<16x1xf32> to vector<16x4xf32>
      %96 = arith.subf %92, %95 : vector<16x4xf32>
      %97 = math.exp %96 : vector<16x4xf32>
      %cst_39 = arith.constant dense<0.000000e+00> : vector<16xf32>
      %98 = vector.multi_reduction <add>, %97, %cst_39 [1] : vector<16x4xf32> to vector<16xf32>
      %99 = vector.shape_cast %98 : vector<16xf32> to vector<16x1xf32>
      %100 = vector.broadcast %99 : vector<16x1xf32> to vector<16x4xf32>
      %101 = arith.divf %97, %100 : vector<16x4xf32>
      %102 = math.log %99 : vector<16x1xf32>
      %103 = vector.broadcast %102 : vector<16x1xf32> to vector<16x4xf32>
      %104 = arith.subf %96, %103 : vector<16x4xf32>
      %105 = arith.mulf %101, %104 : vector<16x4xf32>
      %106 = vector.shape_cast %105 : vector<16x4xf32> to vector<1x16x4xf32>
      %cst_40 = arith.constant dense<0.000000e+00> : vector<1xf32>
      %107 = vector.multi_reduction <add>, %106, %cst_40 [1, 2] : vector<1x16x4xf32> to vector<1xf32>
      %108 = vector.shape_cast %107 : vector<1xf32> to vector<1x1x1xf32>
      %109 = vector.extract %108[0, 0, 0] : f32 from vector<1x1x1xf32>
      %cst_41 = arith.constant 0.000000e+00 : f32
      %110 = arith.subf %cst_41, %109 : f32
      %cst_42 = arith.constant 1.600000e+01 : f32
      %111 = arith.divf %110, %cst_42 : f32
      %c0_i32_43 = arith.constant 0 : i32
      %112 = vector.broadcast %c0_i32_43 : i32 to vector<8x128xi32>
      %113 = arith.cmpi eq, %0, %112 : vector<8x128xi32>
      %cst_44 = arith.constant 0.000000e+00 : f32
      %114 = vector.broadcast %91 : f32 to vector<8x128xf32>
      %115 = vector.broadcast %cst_44 : f32 to vector<8x128xf32>
      %116 = arith.select %113, %114, %115 : vector<8x128xi1>, vector<8x128xf32>
      %c2_i32 = arith.constant 2 : i32
      %117 = vector.broadcast %c2_i32 : i32 to vector<8x128xi32>
      %118 = arith.cmpi eq, %0, %117 : vector<8x128xi32>
      %cst_45 = arith.constant 0.000000e+00 : f32
      %119 = vector.broadcast %111 : f32 to vector<8x128xf32>
      %120 = vector.broadcast %cst_45 : f32 to vector<8x128xf32>
      %121 = arith.select %118, %119, %120 : vector<8x128xi1>, vector<8x128xf32>
      %122 = arith.addf %116, %121 : vector<8x128xf32>
      %c0_46 = arith.constant 0 : index
      %c0_47 = arith.constant 0 : index
      %123 = vector.load %arg6[%c0_46, %c0_47] : memref<8x128xf32, #tpu.memory_space<vmem>>, vector<8x128xf32>
      tpu.vector_store %arg6[%c0_46, %c0_47], %122 {strides = array<i32>} : memref<8x128xf32, #tpu.memory_space<vmem>>, vector<8x128xf32>,
    } else {
    }
    return
  }
  func.func @transform_0(%arg0: i32) -> (i32, i32, i32) {
    %c0_i32 = arith.constant 0 : i32
    %c0_i32_0 = arith.constant 0 : i32
    %c0_i32_1 = arith.constant 0 : i32
    return %arg0, %c0_i32, %c0_i32_0 : i32, i32, i32
  }
  func.func @transform_1(%arg0: i32) -> (i32, i32, i32) {
    %c0_i32 = arith.constant 0 : i32
    %c0_i32_0 = arith.constant 0 : i32
    %c0_i32_1 = arith.constant 0 : i32
    return %arg0, %c0_i32, %c0_i32_0 : i32, i32, i32
  }
  func.func @transform_2(%arg0: i32) -> (i32, i32) {
    %c0_i32 = arith.constant 0 : i32
    %c0_i32_0 = arith.constant 0 : i32
    %c0_i32_1 = arith.constant 0 : i32
    return %c0_i32, %c0_i32_0 : i32, i32
  }
  func.func @transform_3(%arg0: i32) -> (i32, i32) {
    %c0_i32 = arith.constant 0 : i32
    %c0_i32_0 = arith.constant 0 : i32
    %c0_i32_1 = arith.constant 0 : i32
    return %c0_i32, %c0_i32_0 : i32, i32
  }
  func.func @transform_4(%arg0: i32) -> (i32, i32) {
    %c0_i32 = arith.constant 0 : i32
    %c0_i32_0 = arith.constant 0 : i32
    %c0_i32_1 = arith.constant 0 : i32
    return %c0_i32, %c0_i32_0 : i32, i32
  }
  func.func @transform_5(%arg0: i32) -> (i32, i32) {
    %c0_i32 = arith.constant 0 : i32
    %c0_i32_0 = arith.constant 0 : i32
    return %arg0, %c0_i32 : i32, i32
  }
}

</mosaic_0001>

<bundles_post_ra>
// kernel: tpu_custom_call.1
= control target key start
LH: loop header
LB: loop body
LE: loop exit
PB: predicated region body
PF: predicated region fallthrough
CT: control target
= control target key end

     0   :  { %10 = vsyncpa [#allocation3], 0  ;;  %s1373_s0 = inlined_call_operand.vmem [shape: f32[2,8,32], index: 0, kind: input, shape index: {}]   ;;  %s1374_s1 = inlined_call_operand.vmem [shape: f32[2,8,32], index: 1, kind: input, shape index: {}]   ;;  %s1375_s2 = inlined_call_operand.vmem [shape: f32[8,4], index: 2, kind: input, shape index: {}]   ;;  %s1376_s3 = inlined_call_operand.vmem [shape: s32[8,1], index: 3, kind: input, shape index: {}]   ;;  %s1377_s4 = inlined_call_operand.vmem [shape: f32[16,4], index: 4, kind: input, shape index: {}]   ;;  %s1378_s5 = inlined_call_operand.hbm [shape: f32[16,128], index: 5, kind: output, shape index: {}]  }
   0x1   :  { %12 = vsyncpa [#allocation3 + $0x1], 0  ;;  %s1187_s18 = smov 0   ;;  %s1189_s19 = smov 0  }
   0x2   :  { %s1191_s20 = smov 0   ;;  %s1193_s21 = smov 0  }
   0x3 LB: > { %s1208_s22 = sadd.s32 4294967295, %s1149_s21   ;;  %s909_s23 = sadd.s32 4294967294, %s1149_s21   ;;  %s1149_s21 = sphi %s1193_s21, %s1384_s21   ;;  %s1145_s20 = sphi %s1191_s20, %s1383_s20   ;;  %s1141_s19 = sphi %s1189_s19, %s1382_s19   ;;  %s1137_s18 = sphi %s1187_s18, %s1381_s18  }
   0x4   : > { %s1212_s24 = sadd.s32 1, %s1149_s21   ;;  %s140_s25 = sadd.s32 1, %s1145_s20 }
   0x5   : > { %s137_s26 = ssub.s32 %s1149_s21, %s1212_s24  ;;  %p150_p0 = scmp.ne.s32.totalorder %s1145_s20, %s1141_s19 }
   0x6   : > { %p138_p1 = scmp.eq.s32.totalorder %s137_s26, 0  ;;  %p151_p2 = scmp.eq.s32.totalorder %s1208_s22, 1 }
   0x7   : > { %p156_p3 = scmp.ne.s32.totalorder %s1141_s19, %s1137_s18  ;;  %p157_p4 = scmp.eq.s32.totalorder %s909_s23, 1 }
   0x8   : > { %s1223_s27 = scalar_select %p138_p1, %s1145_s20, %s140_s25  }
   0x9   : > { %p1225_p5 = por %p151_p2, %p150_p0  ;;  %p1229_p6 = por %p157_p4, %p156_p3 }
   0xa   : > { %p912_p7 = scmp.ge.s32.totalorder %s1149_s21, 1  ;;  %p198_p8 = scmp.lt.s32.totalorder %s1149_s21, 3 }
   0xc   : > { %p199_p9 = pnand %p912_p7, %p198_p8 }
   0xd   : > { %s226_s30 = sand.u32 (!%p199_p9), 1, %s1141_s19   ;;  %p229_p10 = scmp.lt.s32.totalorder (!%p199_p9), %s1208_s22, 1 }
   0xe   : > { %202 = sbr.rel (%p199_p9) target bundleno = 1582 (0x62e), region = 40  ;;  %s913_s6 = sshll.u32 (!%p199_p9), %s226_s30, 3 }
   0xf   : > { %s1253_s15 = scalar_lea.vmem (!%p199_p9), [#allocation2], %s913_s6  ;;  %p916_p11 = scmp.ne.s32.totalorder (!%p199_p9), %s1208_s22, 0 }
  0x13   : > { %v238_v0 = vlaneseq  ;;  %s230_s7 = scalar_select %p229_p10, %s1208_s22, 1 }
  0x14   : > { %243 = sbr.rel (%p916_p11) target bundleno = 789 (0x315), region = 44 }
  0x15   : > { %v1240_v1 = vand.u32 127, %v238_v0  ;;  %s914_s8 = sshll.u32 %s230_s7, 3 }
  0x16   : > { %s1246_s11 = scalar_lea.vmem %s1373_s0, %s914_s8  ;;  %s1251_s14 = scalar_lea.vmem %s1374_s1, %s914_s8 }
  0x19   : > { %v244_v2 = vld [vmem:[%s1246_s11] sm:$0xff]  ;;  %vm247_vm0 = vcmask 261120   ;;  %v1151_v8 = vmov 0.0   ;;  %vm1152_vm1 = vmmov 0   ;;  %vm482_vm2 = vcmask 31744  }
  0x1a   : > { %v245_v3 = vld [vmem:[%s1251_s14] sm:$0xff]  ;;  %v246_v4 = vmul.f32 %v244_v2, %v244_v2  ;;  %947 = vmatprep.subr.bf16.mxu0 %v1151_v8  ;;  %953 = vmatprep.subr.bf16.mxu1 %v1151_v8  ;;  %v1153_v11 = vmov 0   ;;  %v402_v54 = vshrl.u32 %v238_v0, 7  ;;  %vm406_vm5 = vcmask 64512  }
  0x1b   : > { %v254_v5 = vmul.f32 %v245_v3, %v245_v3  ;;  %949 = vmatprep.mubr.msk.bf16.mxu0 %vm1152_vm1, %v1151_v8  ;;  %955 = vmatprep.mubr.msk.bf16.mxu1 %vm1152_vm1, %v1151_v8  ;;  %v480_v9 = vld [vmem:[%s1375_s2] sm:$0xff]  ;;  %vm431_vm6 = vcmask 57344   ;;  %vm449_vm7 = vcmask 7168   ;;  %vm519_vm8 = vcmp.eq.s32.totalorder %v1240_v1, 0 }
  0x1c   : > { %v248_v6 = vsel %vm247_vm0, %v246_v4, 0.0  ;;  %v483_v10 = vsel %vm482_vm2, %v480_v9, -inf  ;;  %1043 = vset.pattern.permute.xlu1 %v1153_v11  ;;  %1044 = vset.pattern.permute.xlu0 %v1153_v11  ;;  %v481_v12 = vld [vmem:[%s1376_s3] sm:$0xff]  ;;  %vm403_vm4 = vcmp.ne.s32.totalorder %v402_v54, %v1240_v1  ;;  %vm522_vm9 = vcmp.eq.s32.totalorder %v1240_v1, 1 }
  0x1d   : > { %249 = vadd.xlane.f32.xlu0 %v248_v6  ;;  %v255_v7 = vsel %vm247_vm0, %v254_v5, 0.0  ;;  %484 = vmax.xlane.f32.xlu1 %v483_v10 }
  0x21   : > { %256 = vadd.xlane.f32.xlu0 %v255_v7 }
  0x2e   : > { %496 = vperm.xlu1 %1043, %v481_v12  }
  0xa6   : > { %v250_v13 = vpop.xlane.xlu0 %249  ;;  %v1277_v26 = vpop.xlane.xlu1 %484 }
  0xa7   : > { %v251_v14 = vmax.f32 %v250_v13, 1e-24  ;;  %v486_v41 = vsub.f32 %v480_v9, %v1277_v26 }
  0xa9   : > { %1045 = vrsqrt.f32 %v251_v14  ;;  %v487_v49 = vmul.f32 1.442695, %v486_v41 }
  0xaa   : > { %v257_v15 = vpop.xlane.xlu0 %256  ;;  %v497_v27 = vpop.permute.xlu1 %496 }
  0xab   : > { %v258_v16 = vmax.f32 %v257_v15, 1e-24  ;;  %vm498_vm3 = vcmp.eq.s32.totalorder %v1240_v1, %v497_v27 }
  0xac   : > { %v923_v28 = vsel %vm498_vm3, 1.0, %v1151_v8 }
  0xad   : > { %1047 = vrsqrt.f32 %v258_v16  ;;  %v501_v29 = vmul.f32 %v923_v28, %v480_v9 }
  0xaf   : > { %v502_v30 = vsel %vm482_vm2, %v501_v29, 0.0 }
  0xb0   : > { %503 = vadd.xlane.f32.xlu1 %v502_v30 }
  0xb6   : > { %v1046_v17 = vpop.eup %1045 }
  0xb7   : > { %v253_v18 = vmul.f32 %v1046_v17, %v244_v2 }
  0xb9   : > { %v261_v19 = vpack.c.bf16 %v253_v18, %v253_v18 }
  0xba   : > { %v1048_v20 = vpop.eup %1047 }
  0xbb   : > { %v264_v21 = vsel %vm247_vm0, %v261_v19, 0  ;;  %v260_v22 = vmul.f32 %v1048_v20, %v245_v3 }
  0xbc   : > { %948 = vmatpush3.bf16.xpose.msra.mxu0 %v264_v21 }
  0xbd   : > { %v262_v23 = vpack.c.bf16 %v260_v22, %v260_v22  ;;  %959 = vmatprep.subr.bf16.mxu0 %v1151_v8  ;;  %v1270_v24 = vmul.f32 %v260_v22, %v253_v18 }
  0xbf   : > { %v311_v25 = vsel %vm247_vm0, %v262_v23, 0  ;;  %v444_v12 = vsel %vm247_vm0, %v1270_v24, 0.0 }
  0xc0   : > { %954 = vmatpush3.bf16.xpose.msra.mxu1 %v311_v25 }
  0xc3   : > { %950 = vmatmul.mubr.msk.bf16.vlgmr.msra.gmra.mxu0 %vm247_vm0, %v261_v19 }
  0xc4   : > { %960 = vmatpush3.bf16.xpose.msra.mxu0 %v311_v25  ;;  %961 = vmatprep.mubr.msk.bf16.mxu0 %vm1152_vm1, %v1151_v8 }
  0xc7   : > { %956 = vmatmul.mubr.msk.bf16.vlgmr.msra.gmra.mxu1 %vm247_vm0, %v261_v19 }
  0xcb   : > { %962 = vmatmul.mubr.msk.bf16.vlgmr.msra.gmra.mxu0 %vm247_vm0, %v262_v23 }
 0x183   : > { %v300_v31 = vpop.f32.mrf.mxu0 }
 0x184   : > { %v918_v32 = vadd.f32 -1.0, %v300_v31  ;;  %v504_v31 = vpop.xlane.xlu1 %503 }
 0x185   : > { %v951_v33 = vpop.f32.mrf.mxu0 }
 0x186   : > { %v307_v34 = vmul.f32 2.0, %v918_v32 }
 0x187   : > { %v303_v35 = vpop.f32.mrf.mxu0  ;;  %v347_v36 = vpop.f32.mrf.mxu1 }
 0x188   : > { %v920_v37 = vadd.f32 -1.0, %v347_v36  ;;  %v308_v38 = vmul.f32 1.442695, %v307_v34 }
 0x189   : > { %v952_v39 = vpop.f32.mrf.mxu0  ;;  %v957_v40 = vpop.f32.mrf.mxu1 }
 0x18a   : > { %v354_v42 = vmul.f32 2.0, %v920_v37  ;;  %1049 = vpow2.f32 %v308_v38 }
 0x18b   : > { %v350_v43 = vpop.f32.mrf.mxu1  ;;  %v391_v44 = vpop.f32.mrf.mxu0 }
 0x18c   : > { %v355_v45 = vmul.f32 1.442695, %v354_v42  ;;  %v922_v46 = vadd.f32 -1.0, %v391_v44 }
 0x18d   : > { %v958_v47 = vpop.f32.mrf.mxu1  ;;  %v963_v48 = vpop.f32.mrf.mxu0 }
 0x18e   : > { %1051 = vpow2.f32 %v355_v45  ;;  %v398_v50 = vmul.f32 2.0, %v922_v46 }
 0x18f   : > { %v394_v51 = vpop.f32.mrf.mxu0  ;;  %1053 = vpow2.f32 %v487_v49 }
 0x190   : > { %v399_v52 = vmul.f32 1.442695, %v398_v50 }
 0x191   : > { %v964_v53 = vpop.f32.mrf.mxu0 }
 0x192   : > { %1055 = vpow2.f32 %v399_v52 }
 0x197   : > { %v1050_v55 = vpop.eup %1049 }
 0x198   : > { %v404_v59 = vsel %vm403_vm4, %v1050_v55, 0.0 }
 0x199   : > { %v407_v2 = vsel %vm406_vm5, %v404_v59, 0.0 }
 0x19b   : > { %v1052_v56 = vpop.eup %1051 }
 0x19c   : > { %v410_v57 = vsel %vm406_vm5, %v1052_v56, 0.0  ;;  %v1054_v60 = vpop.eup %1053 }
 0x19d   : > { %411 = vadd.xlane.f32.xlu0 %v410_v57  ;;  %v415_v58 = vrot.slane %v410_v57, 4  ;;  %v489_v6 = vsel %vm482_vm2, %v1054_v60, 0.0 }
 0x19f   : > { %v1056_v61 = vpop.eup %1055  ;;  %v416_v62 = vadd.f32 %v415_v58, %v410_v57 }
 0x1a0   : > { %v405_v63 = vsel %vm403_vm4, %v1056_v61, 0.0 }
 0x1a1   : > { %v417_v3 = vrot.slane %v416_v62, 2  ;;  %v421_v4 = vsel %vm406_vm5, %v405_v63, 0.0  ;;  %408 = vadd.xlane.f32.xlu0 %v407_v2 }
 0x1a2   : > { %v422_v5 = vrot.slane %v421_v4, 4 }
 0x1a3   : > { %v418_v7 = vadd.f32 %v417_v3, %v416_v62 }
 0x1a4   : > { %v423_v8 = vadd.f32 %v422_v5, %v421_v4 }
 0x1a5   : > { %490 = vadd.xlane.f32.xlu0 %v489_v6  ;;  %v419_v10 = vrot.slane %v418_v7, 1 }
 0x1a6   : > { %v424_v9 = vrot.slane %v423_v8, 2 }
 0x1a7   : > { %v420_v14 = vadd.f32 %v419_v10, %v418_v7 }
 0x1a8   : > { %v425_v11 = vadd.f32 %v424_v9, %v423_v8 }
 0x1a9   : > { %445 = vadd.xlane.f32.xlu0 %v444_v12 }
 0x1aa   : > { %v426_v13 = vrot.slane %v425_v11, 1 }
 0x1ac   : > { %v427_v15 = vadd.f32 %v426_v13, %v425_v11 }
 0x1ae   : > { %v428_v16 = vadd.f32 %v427_v15, %v420_v14 }
 0x1b0   : > { %1057 = vlog2.f32 %v428_v16 }
 0x1bd   : > { %v1058_v17 = vpop.eup %1057 }
 0x1be   : > { %v430_v18 = vmul.f32 0.6931472, %v1058_v17 }
 0x1c0   : > { %v432_v19 = vsel %vm431_vm6, %v430_v18, 0.0 }
 0x1c1   : > { %433 = vadd.xlane.f32.xlu0 %v432_v19 }
 0x226   : > { %v412_v20 = vpop.xlane.xlu0 %411 }
 0x22a   : > { %v409_v21 = vpop.xlane.xlu0 %408 }
 0x22b   : > { %v413_v22 = vadd.f32 %v412_v20, %v409_v21 }
 0x22d   : > { %1059 = vlog2.f32 %v413_v22 }
 0x22e   : > { %v491_v23 = vpop.xlane.xlu0 %490 }
 0x22f   : > { %1061 = vlog2.f32 %v491_v23 }
 0x232   : > { %v446_v30 = vpop.xlane.xlu0 %445 }
 0x233   : > { %v465_v34 = vsel %vm449_vm7, %v446_v30, 0.0 }
 0x23a   : > { %v1060_v25 = vpop.eup %1059 }
 0x23b   : > { %v448_v27 = vmul.f32 0.6931472, %v1060_v25 }
 0x23c   : > { %v1062_v24 = vpop.eup %1061 }
 0x23d   : > { %v493_v28 = vmul.f32 0.6931472, %v1062_v24  ;;  %v450_v29 = vsel %vm449_vm7, %v448_v27, 0.0 }
 0x23e   : > { %451 = vadd.xlane.f32.xlu0 %v450_v29 }
 0x23f   : > { %v494_v32 = vadd.f32 %v493_v28, %v1277_v26 }
 0x241   : > { %v505_v33 = vsub.f32 %v494_v32, %v504_v31 }
 0x242   : > { %466 = vadd.xlane.f32.xlu0 %v465_v34 }
 0x243   : > { %v506_v35 = vsel %vm449_vm7, %v505_v33, 0.0 }
 0x246   : > { %507 = vadd.xlane.f32.xlu0 %v506_v35 }
 0x24a   : > { %v434_v36 = vpop.xlane.xlu0 %433 }
 0x24b   : > { %v435_v37 = vrot.slane %v434_v36, 4 }
 0x24d   : > { %v436_v38 = vadd.f32 %v435_v37, %v434_v36 }
 0x24f   : > { %v437_v39 = vrot.slane %v436_v38, 2 }
 0x251   : > { %v438_v40 = vadd.f32 %v437_v39, %v436_v38 }
 0x253   : > { %v439_v41 = vrot.slane %v438_v40, 1 }
 0x255   : > { %v440_v42 = vadd.f32 %v439_v41, %v438_v40 }
 0x257   : > { %983 = vpush %v440_v42 }
 0x288   : > { %s984_s26 = spop %983 }
 0x2c7   : > { %v452_v43 = vpop.xlane.xlu0 %451 }
 0x2c8   : > { %v453_v44 = vrot.slane %v452_v43, 4 }
 0x2ca   : > { %v454_v45 = vadd.f32 %v453_v44, %v452_v43 }
 0x2cb   : > { %v467_v46 = vpop.xlane.xlu0 %466 }
 0x2cc   : > { %v455_v47 = vrot.slane %v454_v45, 2  ;;  %v468_v48 = vrot.slane %v467_v46, 4 }
 0x2ce   : > { %v469_v26 = vadd.f32 %v468_v48, %v467_v46  ;;  %v456_v49 = vadd.f32 %v455_v47, %v454_v45 }
 0x2cf   : > { %v508_v50 = vpop.xlane.xlu0 %507 }
 0x2d0   : > { %v470_v51 = vrot.slane %v469_v26, 2  ;;  %v509_v52 = vrot.slane %v508_v50, 4  ;;  %v457_v53 = vrot.slane %v456_v49, 1 }
 0x2d2   : > { %v510_v54 = vadd.f32 %v509_v52, %v508_v50  ;;  %v458_v55 = vadd.f32 %v457_v53, %v456_v49  ;;  %v471_v56 = vadd.f32 %v470_v51, %v469_v26 }
 0x2d4   : > { %v511_v57 = vrot.slane %v510_v54, 2  ;;  %985 = vpush %v458_v55  ;;  %v472_v58 = vrot.slane %v471_v56, 1 }
 0x2d6   : > { %v512_v59 = vadd.f32 %v511_v57, %v510_v54  ;;  %v473_v60 = vadd.f32 %v472_v58, %v471_v56 }
 0x2d8   : > { %987 = vpush %v473_v60  ;;  %v513_v61 = vrot.slane %v512_v59, 1 }
 0x2da   : > { %v514_v62 = vadd.f32 %v513_v61, %v512_v59 }
 0x2dc   : > { %989 = vpush %v514_v62 }
 0x305   : > { %s986_s6 = spop %985 }
 0x306   : > { %s460_s7 = sadd.f32 %s986_s6, %s984_s26 }
 0x308   : > { %s463_s8 = smul.f32 0.0625, %s460_s7 }
 0x309   : > { %s988_s9 = spop %987 }
 0x30a   : > { %s477_s10 = smul.f32 0.125, %s988_s9  ;;  %s464_s12 = sadd.f32 2.0, %s463_s8 }
 0x30c   : > { %s478_s13 = smul.f32 2.0, %s477_s10 }
 0x30d   : > { %s990_s16 = spop %989 }
 0x30e   : > { %s479_s17 = ssub.f32 %s464_s12, %s478_s13  ;;  %s518_s23 = smul.f32 0.125, %s990_s16 }
 0x310   : > { %v520_v63 = vstv %s479_s17  ;;  %v523_v2 = vstv %s518_s23 }
 0x311   : > { %v521_v3 = vsel %vm519_vm8, %v520_v63, 0.0  ;;  %v524_v4 = vsel %vm522_vm9, %v523_v2, 0.0 }
 0x312   : > { %v525_v5 = vadd.f32 %v524_v4, %v521_v3 }
 0x314   : > { %526 = vst [vmem:[%s1253_s15] sm:$0xff] %v525_v5 }
 0x315 PF: > { %p924_p12 = scmp.ne.s32.totalorder %s1208_s22, 1 }
 0x317   : > { %530 = sbr.rel (%p924_p12) target bundleno = 1559 (0x617), region = 48 }
 0x31c   : > { %v531_v6 = vld [vmem:[%s1246_s11] sm:$0xff]  ;;  %vm534_vm10 = vcmask 261120   ;;  %v1154_v12 = vmov 0.0   ;;  %vm1155_vm11 = vmmov 0   ;;  %vm769_vm12 = vcmask 31744   ;;  %v768_v14 = vld [vmem:[%s1377_s4 + $0x8] sm:$0xff] }
 0x31d   : > { %v532_v7 = vld [vmem:[%s1251_s14] sm:$0xff]  ;;  %v533_v8 = vmul.f32 %v531_v6, %v531_v6  ;;  %965 = vmatprep.subr.bf16.mxu0 %v1154_v12  ;;  %971 = vmatprep.subr.bf16.mxu1 %v1154_v12  ;;  %v773_v16 = vsel %vm769_vm12, %v768_v14, -inf  ;;  %v689_v57 = vshrl.u32 %v238_v0, 7  ;;  %vm693_vm14 = vcmask 64512  }
 0x31e   : > { %v541_v9 = vmul.f32 %v532_v7, %v532_v7  ;;  %967 = vmatprep.mubr.msk.bf16.mxu0 %vm1155_vm11, %v1154_v12  ;;  %973 = vmatprep.mubr.msk.bf16.mxu1 %vm1155_vm11, %v1154_v12  ;;  %v767_v13 = vld [vmem:[%s1377_s4] sm:$0xff]  ;;  %vm718_vm15 = vcmask 57344   ;;  %vm736_vm0 = vcmask 7168   ;;  %vm816_vm1 = vcmp.eq.s32.totalorder %v1240_v1, 0 }
 0x31f   : > { %v535_v10 = vsel %vm534_vm10, %v533_v8, 0.0  ;;  %v770_v15 = vsel %vm769_vm12, %v767_v13, -inf  ;;  %vm690_vm13 = vcmp.ne.s32.totalorder %v689_v57, %v1240_v1  ;;  %vm819_vm2 = vcmp.eq.s32.totalorder %v1240_v1, 2 }
 0x320   : > { %536 = vadd.xlane.f32.xlu0 %v535_v10  ;;  %v542_v11 = vsel %vm534_vm10, %v541_v9, 0.0  ;;  %771 = vmax.xlane.f32.xlu1 %v770_v15 }
 0x324   : > { %543 = vadd.xlane.f32.xlu0 %v542_v11  ;;  %774 = vmax.xlane.f32.xlu1 %v773_v16 }
 0x3a9   : > { %v537_v17 = vpop.xlane.xlu0 %536  ;;  %v772_v31 = vpop.xlane.xlu1 %771 }
 0x3aa   : > { %v538_v18 = vmax.f32 %v537_v17, 1e-24  ;;  %v1312_v34 = vsub.f32 %v767_v13, %v772_v31 }
 0x3ac   : > { %1063 = vrsqrt.f32 %v538_v18  ;;  %v778_v41 = vmul.f32 1.442695, %v1312_v34 }
 0x3ad   : > { %v544_v19 = vpop.xlane.xlu0 %543  ;;  %v775_v32 = vpop.xlane.xlu1 %774 }
 0x3ae   : > { %v545_v20 = vmax.f32 %v544_v19, 1e-24  ;;  %v1314_v37 = vsub.f32 %v768_v14, %v775_v32 }
 0x3b0   : > { %1065 = vrsqrt.f32 %v545_v20  ;;  %v780_v46 = vmul.f32 1.442695, %v1314_v37 }
 0x3b9   : > { %v1064_v21 = vpop.eup %1063 }
 0x3ba   : > { %v540_v22 = vmul.f32 %v1064_v21, %v531_v6 }
 0x3bc   : > { %v548_v23 = vpack.c.bf16 %v540_v22, %v540_v22 }
 0x3bd   : > { %v1066_v25 = vpop.eup %1065 }
 0x3be   : > { %v551_v27 = vsel %vm534_vm10, %v548_v23, 0  ;;  %v547_v24 = vmul.f32 %v1066_v25, %v532_v7 }
 0x3bf   : > { %966 = vmatpush3.bf16.xpose.msra.mxu0 %v551_v27 }
 0x3c0   : > { %v549_v28 = vpack.c.bf16 %v547_v24, %v547_v24  ;;  %977 = vmatprep.subr.bf16.mxu0 %v1154_v12  ;;  %v730_v29 = vmul.f32 %v547_v24, %v540_v22 }
 0x3c2   : > { %v598_v30 = vsel %vm534_vm10, %v549_v28, 0  ;;  %v731_v10 = vsel %vm534_vm10, %v730_v29, 0.0 }
 0x3c3   : > { %972 = vmatpush3.bf16.xpose.msra.mxu1 %v598_v30 }
 0x3c6   : > { %968 = vmatmul.mubr.msk.bf16.vlgmr.msra.gmra.mxu0 %vm534_vm10, %v548_v23 }
 0x3c7   : > { %978 = vmatpush3.bf16.xpose.msra.mxu0 %v598_v30  ;;  %979 = vmatprep.mubr.msk.bf16.mxu0 %vm1155_vm11, %v1154_v12 }
 0x3ca   : > { %974 = vmatmul.mubr.msk.bf16.vlgmr.msra.gmra.mxu1 %vm534_vm10, %v548_v23 }
 0x3ce   : > { %980 = vmatmul.mubr.msk.bf16.vlgmr.msra.gmra.mxu0 %vm534_vm10, %v549_v28 }
 0x486   : > { %v587_v33 = vpop.f32.mrf.mxu0 }
 0x487   : > { %v926_v35 = vadd.f32 -1.0, %v587_v33 }
 0x488   : > { %v969_v36 = vpop.f32.mrf.mxu0 }
 0x489   : > { %v594_v38 = vmul.f32 2.0, %v926_v35 }
 0x48a   : > { %v590_v39 = vpop.f32.mrf.mxu0  ;;  %v634_v40 = vpop.f32.mrf.mxu1 }
 0x48b   : > { %v595_v42 = vmul.f32 1.442695, %v594_v38  ;;  %v928_v43 = vadd.f32 -1.0, %v634_v40 }
 0x48c   : > { %v970_v44 = vpop.f32.mrf.mxu0  ;;  %v975_v45 = vpop.f32.mrf.mxu1 }
 0x48d   : > { %1067 = vpow2.f32 %v595_v42  ;;  %v641_v47 = vmul.f32 2.0, %v928_v43 }
 0x48e   : > { %1069 = vpow2.f32 %v778_v41  ;;  %v637_v48 = vpop.f32.mrf.mxu1  ;;  %v678_v26 = vpop.f32.mrf.mxu0 }
 0x48f   : > { %v642_v49 = vmul.f32 1.442695, %v641_v47  ;;  %v930_v50 = vadd.f32 -1.0, %v678_v26  ;;  %1071 = vpow2.f32 %v780_v46 }
 0x490   : > { %v976_v51 = vpop.f32.mrf.mxu1  ;;  %v981_v52 = vpop.f32.mrf.mxu0 }
 0x491   : > { %1073 = vpow2.f32 %v642_v49  ;;  %v685_v53 = vmul.f32 2.0, %v930_v50 }
 0x492   : > { %v681_v54 = vpop.f32.mrf.mxu0 }
 0x493   : > { %v686_v55 = vmul.f32 1.442695, %v685_v53 }
 0x494   : > { %v982_v56 = vpop.f32.mrf.mxu0 }
 0x495   : > { %1075 = vpow2.f32 %v686_v55 }
 0x49a   : > { %v1068_v58 = vpop.eup %1067 }
 0x49b   : > { %v1070_v59 = vpop.eup %1069  ;;  %v691_v60 = vsel %vm690_vm13, %v1068_v58, 0.0 }
 0x49c   : > { %v694_v61 = vsel %vm693_vm14, %v691_v60, 0.0  ;;  %v1072_v62 = vpop.eup %1071  ;;  %v782_v2 = vsel %vm769_vm12, %v1070_v59, 0.0 }
 0x49d   : > { %695 = vadd.xlane.f32.xlu0 %v694_v61  ;;  %v785_v4 = vsel %vm769_vm12, %v1072_v62, 0.0 }
 0x49e   : > { %v1074_v63 = vpop.eup %1073 }
 0x49f   : > { %v697_v3 = vsel %vm693_vm14, %v1074_v63, 0.0 }
 0x4a0   : > { %698 = vadd.xlane.f32.xlu1 %v697_v3  ;;  %v702_v0 = vrot.slane %v697_v3, 4 }
 0x4a1   : > { %783 = vadd.xlane.f32.xlu0 %v782_v2 }
 0x4a2   : > { %v1076_v5 = vpop.eup %1075  ;;  %v703_v6 = vadd.f32 %v702_v0, %v697_v3 }
 0x4a3   : > { %v692_v7 = vsel %vm690_vm13, %v1076_v5, 0.0 }
 0x4a4   : > { %v708_v8 = vsel %vm693_vm14, %v692_v7, 0.0  ;;  %v704_v9 = vrot.slane %v703_v6, 2  ;;  %786 = vadd.xlane.f32.xlu1 %v785_v4 }
 0x4a5   : > { %v709_v11 = vrot.slane %v708_v8, 4  ;;  %732 = vadd.xlane.f32.xlu0 %v731_v10 }
 0x4a6   : > { %v705_v13 = vadd.f32 %v704_v9, %v703_v6 }
 0x4a7   : > { %v710_v12 = vadd.f32 %v709_v11, %v708_v8 }
 0x4a8   : > { %v706_v16 = vrot.slane %v705_v13, 1 }
 0x4a9   : > { %v711_v14 = vrot.slane %v710_v12, 2 }
 0x4aa   : > { %v707_v18 = vadd.f32 %v706_v16, %v705_v13 }
 0x4ab   : > { %v712_v15 = vadd.f32 %v711_v14, %v710_v12 }
 0x4ad   : > { %v713_v17 = vrot.slane %v712_v15, 1 }
 0x4af   : > { %v714_v19 = vadd.f32 %v713_v17, %v712_v15 }
 0x4b1   : > { %v715_v20 = vadd.f32 %v714_v19, %v707_v18 }
 0x4b3   : > { %1077 = vlog2.f32 %v715_v20 }
 0x4c0   : > { %v1078_v21 = vpop.eup %1077 }
 0x4c1   : > { %v717_v22 = vmul.f32 0.6931472, %v1078_v21 }
 0x4c3   : > { %v719_v23 = vsel %vm718_vm15, %v717_v22, 0.0 }
 0x4c4   : > { %720 = vadd.xlane.f32.xlu1 %v719_v23 }
 0x526   : > { %v696_v25 = vpop.xlane.xlu0 %695 }
 0x529   : > { %v699_v27 = vpop.xlane.xlu1 %698 }
 0x52a   : > { %v700_v24 = vadd.f32 %v699_v27, %v696_v25  ;;  %v784_v28 = vpop.xlane.xlu0 %783 }
 0x52b   : > { %1079 = vrcp.f32 %v784_v28 }
 0x52c   : > { %1081 = vlog2.f32 %v700_v24 }
 0x52d   : > { %1083 = vlog2.f32 %v784_v28  ;;  %v787_v29 = vpop.xlane.xlu1 %786 }
 0x52e   : > { %1085 = vrcp.f32 %v787_v29  ;;  %v733_v30 = vpop.xlane.xlu0 %732 }
 0x52f   : > { %1087 = vlog2.f32 %v787_v29  ;;  %v752_v31 = vsel %vm736_vm0, %v733_v30, 0.0 }
 0x530   : > { %753 = vadd.xlane.f32.xlu1 %v752_v31 }
 0x538   : > { %v1080_v32 = vpop.eup %1079 }
 0x539   : > { %v1082_v33 = vpop.eup %1081  ;;  %v789_v43 = vmul.f32 %v1080_v32, %v1070_v59 }
 0x53a   : > { %v1084_v35 = vpop.eup %1083  ;;  %v735_v36 = vmul.f32 0.6931472, %v1082_v33 }
 0x53b   : > { %v1086_v38 = vpop.eup %1085  ;;  %v793_v39 = vmul.f32 0.6931472, %v1084_v35 }
 0x53c   : > { %v1088_v40 = vpop.eup %1087  ;;  %v737_v41 = vsel %vm736_vm0, %v735_v36, 0.0  ;;  %v791_v45 = vmul.f32 %v1086_v38, %v1072_v62 }
 0x53d   : > { %v795_v42 = vmul.f32 0.6931472, %v1088_v40  ;;  %738 = vadd.xlane.f32.xlu0 %v737_v41  ;;  %v796_v44 = vsub.f32 %v1312_v34, %v793_v39 }
 0x53f   : > { %v797_v46 = vsub.f32 %v1314_v37, %v795_v42  ;;  %v798_v47 = vmul.f32 %v796_v44, %v789_v43 }
 0x541   : > { %v799_v48 = vmul.f32 %v797_v46, %v791_v45  ;;  %v800_v26 = vsel %vm769_vm12, %v798_v47, 0.0 }
 0x543   : > { %v801_v49 = vsel %vm769_vm12, %v799_v48, 0.0 }
 0x544   : > { %v802_v50 = vadd.f32 %v801_v49, %v800_v26 }
 0x546   : > { %803 = vadd.xlane.f32.xlu0 %v802_v50 }
 0x54d   : > { %v721_v51 = vpop.xlane.xlu1 %720 }
 0x54e   : > { %v722_v52 = vrot.slane %v721_v51, 4 }
 0x550   : > { %v723_v53 = vadd.f32 %v722_v52, %v721_v51 }
 0x552   : > { %v724_v54 = vrot.slane %v723_v53, 2 }
 0x554   : > { %v725_v55 = vadd.f32 %v724_v54, %v723_v53 }
 0x556   : > { %v726_v56 = vrot.slane %v725_v55, 1 }
 0x558   : > { %v727_v57 = vadd.f32 %v726_v56, %v725_v55 }
 0x55a   : > { %991 = vpush %v727_v57 }
 0x58b   : > { %s992_s6 = spop %991 }
 0x5b9   : > { %v754_v34 = vpop.xlane.xlu1 %753 }
 0x5ba   : > { %v755_v58 = vrot.slane %v754_v34, 4 }
 0x5bc   : > { %v756_v59 = vadd.f32 %v755_v58, %v754_v34 }
 0x5be   : > { %v757_v37 = vrot.slane %v756_v59, 2 }
 0x5c0   : > { %v758_v63 = vadd.f32 %v757_v37, %v756_v59 }
 0x5c2   : > { %v759_v0 = vrot.slane %v758_v63, 1 }
 0x5c4   : > { %v760_v9 = vadd.f32 %v759_v0, %v758_v63 }
 0x5c6   : > { %v739_v60 = vpop.xlane.xlu0 %738 }
 0x5c7   : > { %v740_v61 = vrot.slane %v739_v60, 4 }
 0x5c9   : > { %v741_v62 = vadd.f32 %v740_v61, %v739_v60 }
 0x5cb   : > { %v742_v2 = vrot.slane %v741_v62, 2 }
 0x5cd   : > { %v743_v3 = vadd.f32 %v742_v2, %v741_v62 }
 0x5cf   : > { %v804_v4 = vpop.xlane.xlu0 %803  ;;  %v744_v5 = vrot.slane %v743_v3, 1 }
 0x5d0   : > { %v805_v6 = vrot.slane %v804_v4, 4 }
 0x5d1   : > { %v745_v7 = vadd.f32 %v744_v5, %v743_v3 }
 0x5d2   : > { %v806_v8 = vadd.f32 %v805_v6, %v804_v4 }
 0x5d3   : > { %993 = vpush %v745_v7 }
 0x5d4   : > { %v807_v10 = vrot.slane %v806_v8, 2  ;;  %995 = vpush %v760_v9 }
 0x5d6   : > { %v808_v11 = vadd.f32 %v807_v10, %v806_v8 }
 0x5d8   : > { %v809_v12 = vrot.slane %v808_v11, 1 }
 0x5da   : > { %v810_v13 = vadd.f32 %v809_v12, %v808_v11 }
 0x5dc   : > { %997 = vpush %v810_v13 }
 0x604   : > { %s994_s7 = spop %993 }
 0x605   : > { %s747_s8 = sadd.f32 %s994_s7, %s992_s6  ;;  %s996_s9 = spop %995 }
 0x606   : > { %s764_s10 = smul.f32 0.125, %s996_s9 }
 0x607   : > { %s750_s12 = smul.f32 0.0625, %s747_s8 }
 0x608   : > { %s765_s16 = smul.f32 2.0, %s764_s10 }
 0x609   : > { %s751_s13 = sadd.f32 2.0, %s750_s12 }
 0x60b   : > { %s766_s17 = ssub.f32 %s751_s13, %s765_s16 }
 0x60d   : > { %s998_s23 = spop %997  ;;  %v817_v14 = vstv %s766_s17 }
 0x60e   : > { %s812_s25 = ssub.f32 0.0, %s998_s23  ;;  %v818_v16 = vsel %vm816_vm1, %v817_v14, 0.0 }
 0x610   : > { %s815_s11 = smul.f32 0.0625, %s812_s25 }
 0x612   : > { %v820_v15 = vstv %s815_s11 }
 0x613   : > { %v821_v17 = vsel %vm819_vm2, %v820_v15, 0.0 }
 0x614   : > { %v822_v18 = vadd.f32 %v821_v17, %v818_v16 }
 0x616   : > { %823 = vst [vmem:[%s1253_s15] sm:$0xff] %v822_v18 }
 0x617 PF: > { %s932_s14 = sshll.u32 %s1208_s22, 7  ;;  %s838_s8 = sshll.u32 %s1253_s15, 4  ;;  %s839_s8 = int_to_ptr.vmem [resolvable:$true] %s838_s8 }
 0x618   : > { %s836_s7 = scalar_lea.hbm %s1378_s5, %s932_s14  ;;  %s825_s9 = scalar_lea.sflag [#allocation3], %s226_s30 }
 0x619   : > { %s1089_s10 = scalar_lea.vmem %s839_s8, 128  ;;  %s1156_s12 = smov [#allocation2]  }
 0x61a   : > { %p1090_p13 = scmp.ne.s32.totalorder %s839_s8, %s1089_s10  ;;  %s1093_s13 = sshll.u32 %s1156_s12, 4  ;;  %s1094_s13 = int_to_ptr.vmem [resolvable:$false] %s1093_s13 }
 0x61b   : > { %s1095_s16 = scalar_lea.vmem %s1094_s13, 256  ;;  %p1096_p2 = scmp.lt.s32.totalorder %s839_s8, %s1094_s13 }
 0x61c   : > { %p1091_p0 = pnand %p1090_p13, %p1225_p5  ;;  %p1097_p3 = scmp.lt.s32.totalorder %s1095_s16, %s1089_s10 }
 0x61e   : > { %p1092_p1 = pneg %p1091_p0  ;;  %p1098_p4 = por %p1097_p3, %p1096_p2 }
 0x620   : > { %p1099_p7 = pnand %p1098_p4, %p1092_p1 }
 0x622   : > { %1102 = shalt.err (!%p1099_p7)
}
 0x623   : > { %s1103_s22 = scalar_lea.hbm %s836_s7, 128  ;;  %s1107_s17 = scalar_lea.hbm %s1378_s5, 256 }
 0x624   : > { %p1104_p8 = scmp.ne.s32.totalorder %s836_s7, %s1103_s22  ;;  %p1108_p11 = scmp.lt.s32.totalorder %s836_s7, %s1378_s5 }
 0x625   : > { %p1109_p12 = scmp.lt.s32.totalorder %s1107_s17, %s1103_s22 }
 0x626   : > { %p1105_p9 = pnand %p1104_p8, %p1225_p5 }
 0x627   : > { %p1110_p13 = por %p1109_p12, %p1108_p11 }
 0x628   : > { %p1106_p10 = pneg %p1105_p9 }
 0x62a   : > { %p1111_p0 = pnand %p1110_p13, %p1106_p10 }
 0x62c   : > { %1114 = shalt.err (!%p1111_p0)
}
 0x62d   : > { %999 = dma.vmem_to_hbm [thread:$0]  (%p1225_p5), %s839_s8, 128, %s836_s7, %s825_s9  }
 0x62e PF: > { %p1005_p1 = scmp.ge.s32.totalorder %s1149_s21, 2  ;;  %s850_s11 = sand.u32 1, %s1137_s18  }
 0x62f   : > { %s851_s14 = scalar_lea.sflag [#allocation3], %s850_s11 }
 0x630   : > { %p1002_p2 = pnand %p1005_p1, %p1229_p6 }
 0x632   : > { %p1003_p3 = pneg %p1002_p2 }
 0x634   : > { %1132 = dma.done.wait (%p1003_p3), %s851_s14, 128  }
 0x635   : > { %1134 = vsyncadd (%p1003_p3), %s851_s14, 4294967168  ;;  %p15_p4 = scmp.ge.s32.totalorder %s1212_s24, 4   ;;  %s1381_s18 = smov %s1141_s19 }
 0x636   : > { %s1382_s19 = smov %s1145_s20  ;;  %s1383_s20 = smov %s1223_s27 }
 0x637   : > { %s1384_s21 = smov %s1212_s24  ;;  %17 = sbr.rel (!%p15_p4) target bundleno = 3 (0x3), region = 86 }
 0x63c   :  { %856 = vsyncpa [#allocation3], 1 }
 0x63d   :  { %858 = vsyncpa [#allocation3 + $0x1], 1 }

// kernel: tpu_custom_call.1
= control target key start
LH: loop header
LB: loop body
LE: loop exit
PB: predicated region body
PF: predicated region fallthrough
CT: control target
= control target key end

     0   :  { %10 = vsyncpa [#allocation3], 0  ;;  %s1373_s0 = inlined_call_operand.vmem [shape: f32[2,8,32], index: 0, kind: input, shape index: {}]   ;;  %s1374_s1 = inlined_call_operand.vmem [shape: f32[2,8,32], index: 1, kind: input, shape index: {}]   ;;  %s1375_s2 = inlined_call_operand.vmem [shape: f32[8,4], index: 2, kind: input, shape index: {}]   ;;  %s1376_s3 = inlined_call_operand.vmem [shape: s32[8,1], index: 3, kind: input, shape index: {}]   ;;  %s1377_s4 = inlined_call_operand.vmem [shape: f32[16,4], index: 4, kind: input, shape index: {}]   ;;  %s1378_s5 = inlined_call_operand.hbm [shape: f32[16,128], index: 5, kind: output, shape index: {}]  }
   0x1   :  { %12 = vsyncpa [#allocation3 + $0x1], 0  ;;  %s1187_s18 = smov 0   ;;  %s1189_s19 = smov 0  }
   0x2   :  { %s1191_s20 = smov 0   ;;  %s1193_s21 = smov 0  }
   0x3 LB: > { %s1208_s22 = sadd.s32 4294967295, %s1149_s21   ;;  %s909_s23 = sadd.s32 4294967294, %s1149_s21   ;;  %s1149_s21 = sphi %s1193_s21, %s1384_s21   ;;  %s1145_s20 = sphi %s1191_s20, %s1383_s20   ;;  %s1141_s19 = sphi %s1189_s19, %s1382_s19   ;;  %s1137_s18 = sphi %s1187_s18, %s1381_s18  }
   0x4   : > { %s1212_s24 = sadd.s32 1, %s1149_s21   ;;  %s140_s25 = sadd.s32 1, %s1145_s20 }
   0x5   : > { %s137_s26 = ssub.s32 %s1149_s21, %s1212_s24  ;;  %p150_p0 = scmp.ne.s32.totalorder %s1145_s20, %s1141_s19 }
   0x6   : > { %p138_p1 = scmp.eq.s32.totalorder %s137_s26, 0  ;;  %p151_p2 = scmp.eq.s32.totalorder %s1208_s22, 1 }
   0x7   : > { %p156_p3 = scmp.ne.s32.totalorder %s1141_s19, %s1137_s18  ;;  %p157_p4 = scmp.eq.s32.totalorder %s909_s23, 1 }
   0x8   : > { %s1223_s27 = scalar_select %p138_p1, %s1145_s20, %s140_s25  }
   0x9   : > { %p1225_p5 = por %p151_p2, %p150_p0  ;;  %p1229_p6 = por %p157_p4, %p156_p3 }
   0xa   : > { %p912_p7 = scmp.ge.s32.totalorder %s1149_s21, 1  ;;  %p198_p8 = scmp.lt.s32.totalorder %s1149_s21, 3 }
   0xc   : > { %p199_p9 = pnand %p912_p7, %p198_p8 }
   0xd   : > { %s226_s30 = sand.u32 (!%p199_p9), 1, %s1141_s19   ;;  %p229_p10 = scmp.lt.s32.totalorder (!%p199_p9), %s1208_s22, 1 }
   0xe   : > { %202 = sbr.rel (%p199_p9) target bundleno = 1582 (0x62e), region = 40  ;;  %s913_s6 = sshll.u32 (!%p199_p9), %s226_s30, 3 }
   0xf   : > { %s1253_s15 = scalar_lea.vmem (!%p199_p9), [#allocation2], %s913_s6  ;;  %p916_p11 = scmp.ne.s32.totalorder (!%p199_p9), %s1208_s22, 0 }
  0x13   : > { %v238_v0 = vlaneseq  ;;  %s230_s7 = scalar_select %p229_p10, %s1208_s22, 1 }
  0x14   : > { %243 = sbr.rel (%p916_p11) target bundleno = 789 (0x315), region = 44 }
  0x15   : > { %v1240_v1 = vand.u32 127, %v238_v0  ;;  %s914_s8 = sshll.u32 %s230_s7, 3 }
  0x16   : > { %s1246_s11 = scalar_lea.vmem %s1373_s0, %s914_s8  ;;  %s1251_s14 = scalar_lea.vmem %s1374_s1, %s914_s8 }
  0x19   : > { %v244_v2 = vld [vmem:[%s1246_s11] sm:$0xff]  ;;  %vm247_vm0 = vcmask 261120   ;;  %v1151_v8 = vmov 0.0   ;;  %vm1152_vm1 = vmmov 0   ;;  %vm482_vm2 = vcmask 31744  }
  0x1a   : > { %v245_v3 = vld [vmem:[%s1251_s14] sm:$0xff]  ;;  %v246_v4 = vmul.f32 %v244_v2, %v244_v2  ;;  %947 = vmatprep.subr.bf16.mxu0 %v1151_v8  ;;  %953 = vmatprep.subr.bf16.mxu1 %v1151_v8  ;;  %v1153_v11 = vmov 0   ;;  %v402_v54 = vshrl.u32 %v238_v0, 7  ;;  %vm406_vm5 = vcmask 64512  }
  0x1b   : > { %v254_v5 = vmul.f32 %v245_v3, %v245_v3  ;;  %949 = vmatprep.mubr.msk.bf16.mxu0 %vm1152_vm1, %v1151_v8  ;;  %955 = vmatprep.mubr.msk.bf16.mxu1 %vm1152_vm1, %v1151_v8  ;;  %v480_v9 = vld [vmem:[%s1375_s2] sm:$0xff]  ;;  %vm431_vm6 = vcmask 57344   ;;  %vm449_vm7 = vcmask 7168   ;;  %vm519_vm8 = vcmp.eq.s32.totalorder %v1240_v1, 0 }
  0x1c   : > { %v248_v6 = vsel %vm247_vm0, %v246_v4, 0.0  ;;  %v483_v10 = vsel %vm482_vm2, %v480_v9, -inf  ;;  %1043 = vset.pattern.permute.xlu1 %v1153_v11  ;;  %1044 = vset.pattern.permute.xlu0 %v1153_v11  ;;  %v481_v12 = vld [vmem:[%s1376_s3] sm:$0xff]  ;;  %vm403_vm4 = vcmp.ne.s32.totalorder %v402_v54, %v1240_v1  ;;  %vm522_vm9 = vcmp.eq.s32.totalorder %v1240_v1, 1 }
  0x1d   : > { %249 = vadd.xlane.f32.xlu0 %v248_v6  ;;  %v255_v7 = vsel %vm247_vm0, %v254_v5, 0.0  ;;  %484 = vmax.xlane.f32.xlu1 %v483_v10 }
  0x21   : > { %256 = vadd.xlane.f32.xlu0 %v255_v7 }
  0x2e   : > { %496 = vperm.xlu1 %1043, %v481_v12  }
  0xa6   : > { %v250_v13 = vpop.xlane.xlu0 %249  ;;  %v1277_v26 = vpop.xlane.xlu1 %484 }
  0xa7   : > { %v251_v14 = vmax.f32 %v250_v13, 1e-24  ;;  %v486_v41 = vsub.f32 %v480_v9, %v1277_v26 }
  0xa9   : > { %1045 = vrsqrt.f32 %v251_v14  ;;  %v487_v49 = vmul.f32 1.442695, %v486_v41 }
  0xaa   : > { %v257_v15 = vpop.xlane.xlu0 %256  ;;  %v497_v27 = vpop.permute.xlu1 %496 }
  0xab   : > { %v258_v16 = vmax.f32 %v257_v15, 1e-24  ;;  %vm498_vm3 = vcmp.eq.s32.totalorder %v1240_v1, %v497_v27 }
  0xac   : > { %v923_v28 = vsel %vm498_vm3, 1.0, %v1151_v8 }
  0xad   : > { %1047 = vrsqrt.f32 %v258_v16  ;;  %v501_v29 = vmul.f32 %v923_v28, %v480_v9 }
  0xaf   : > { %v502_v30 = vsel %vm482_vm2, %v501_v29, 0.0 }
  0xb0   : > { %503 = vadd.xlane.f32.xlu1 %v502_v30 }
  0xb6   : > { %v1046_v17 = vpop.eup %1045 }
  0xb7   : > { %v253_v18 = vmul.f32 %v1046_v17, %v244_v2 }
  0xb9   : > { %v261_v19 = vpack.c.bf16 %v253_v18, %v253_v18 }
  0xba   : > { %v1048_v20 = vpop.eup %1047 }
  0xbb   : > { %v264_v21 = vsel %vm247_vm0, %v261_v19, 0  ;;  %v260_v22 = vmul.f32 %v1048_v20, %v245_v3 }
  0xbc   : > { %948 = vmatpush3.bf16.xpose.msra.mxu0 %v264_v21 }
  0xbd   : > { %v262_v23 = vpack.c.bf16 %v260_v22, %v260_v22  ;;  %959 = vmatprep.subr.bf16.mxu0 %v1151_v8  ;;  %v1270_v24 = vmul.f32 %v260_v22, %v253_v18 }
  0xbf   : > { %v311_v25 = vsel %vm247_vm0, %v262_v23, 0  ;;  %v444_v12 = vsel %vm247_vm0, %v1270_v24, 0.0 }
  0xc0   : > { %954 = vmatpush3.bf16.xpose.msra.mxu1 %v311_v25 }
  0xc3   : > { %950 = vmatmul.mubr.msk.bf16.vlgmr.msra.gmra.mxu0 %vm247_vm0, %v261_v19 }
  0xc4   : > { %960 = vmatpush3.bf16.xpose.msra.mxu0 %v311_v25  ;;  %961 = vmatprep.mubr.msk.bf16.mxu0 %vm1152_vm1, %v1151_v8 }
  0xc7   : > { %956 = vmatmul.mubr.msk.bf16.vlgmr.msra.gmra.mxu1 %vm247_vm0, %v261_v19 }
  0xcb   : > { %962 = vmatmul.mubr.msk.bf16.vlgmr.msra.gmra.mxu0 %vm247_vm0, %v262_v23 }
 0x183   : > { %v300_v31 = vpop.f32.mrf.mxu0 }
 0x184   : > { %v918_v32 = vadd.f32 -1.0, %v300_v31  ;;  %v504_v31 = vpop.xlane.xlu1 %503 }
 0x185   : > { %v951_v33 = vpop.f32.mrf.mxu0 }
 0x186   : > { %v307_v34 = vmul.f32 2.0, %v918_v32 }
 0x187   : > { %v303_v35 = vpop.f32.mrf.mxu0  ;;  %v347_v36 = vpop.f32.mrf.mxu1 }
 0x188   : > { %v920_v37 = vadd.f32 -1.0, %v347_v36  ;;  %v308_v38 = vmul.f32 1.442695, %v307_v34 }
 0x189   : > { %v952_v39 = vpop.f32.mrf.mxu0  ;;  %v957_v40 = vpop.f32.mrf.mxu1 }
 0x18a   : > { %v354_v42 = vmul.f32 2.0, %v920_v37  ;;  %1049 = vpow2.f32 %v308_v38 }
 0x18b   : > { %v350_v43 = vpop.f32.mrf.mxu1  ;;  %v391_v44 = vpop.f32.mrf.mxu0 }
 0x18c   : > { %v355_v45 = vmul.f32 1.442695, %v354_v42  ;;  %v922_v46 = vadd.f32 -1.0, %v391_v44 }
 0x18d   : > { %v958_v47 = vpop.f32.mrf.mxu1  ;;  %v963_v48 = vpop.f32.mrf.mxu0 }
 0x18e   : > { %1051 = vpow2.f32 %v355_v45  ;;  %v398_v50 = vmul.f32 2.0, %v922_v46 }
 0x18f   : > { %v394_v51 = vpop.f32.mrf.mxu0  ;;  %1053 = vpow2.f32 %v487_v49 }
 0x190   : > { %v399_v52 = vmul.f32 1.442695, %v398_v50 }
 0x191   : > { %v964_v53 = vpop.f32.mrf.mxu0 }
 0x192   : > { %1055 = vpow2.f32 %v399_v52 }
 0x197   : > { %v1050_v55 = vpop.eup %1049 }
 0x198   : > { %v404_v59 = vsel %vm403_vm4, %v1050_v55, 0.0 }
 0x199   : > { %v407_v2 = vsel %vm406_vm5, %v404_v59, 0.0 }
 0x19b   : > { %v1052_v56 = vpop.eup %1051 }
 0x19c   : > { %v410_v57 = vsel %vm406_vm5, %v1052_v56, 0.0  ;;  %v1054_v60 = vpop.eup %1053 }
 0x19d   : > { %411 = vadd.xlane.f32.xlu0 %v410_v57  ;;  %v415_v58 = vrot.slane %v410_v57, 4  ;;  %v489_v6 = vsel %vm482_vm2, %v1054_v60, 0.0 }
 0x19f   : > { %v1056_v61 = vpop.eup %1055  ;;  %v416_v62 = vadd.f32 %v415_v58, %v410_v57 }
 0x1a0   : > { %v405_v63 = vsel %vm403_vm4, %v1056_v61, 0.0 }
 0x1a1   : > { %v417_v3 = vrot.slane %v416_v62, 2  ;;  %v421_v4 = vsel %vm406_vm5, %v405_v63, 0.0  ;;  %408 = vadd.xlane.f32.xlu0 %v407_v2 }
 0x1a2   : > { %v422_v5 = vrot.slane %v421_v4, 4 }
 0x1a3   : > { %v418_v7 = vadd.f32 %v417_v3, %v416_v62 }
 0x1a4   : > { %v423_v8 = vadd.f32 %v422_v5, %v421_v4 }
 0x1a5   : > { %490 = vadd.xlane.f32.xlu0 %v489_v6  ;;  %v419_v10 = vrot.slane %v418_v7, 1 }
 0x1a6   : > { %v424_v9 = vrot.slane %v423_v8, 2 }
 0x1a7   : > { %v420_v14 = vadd.f32 %v419_v10, %v418_v7 }
 0x1a8   : > { %v425_v11 = vadd.f32 %v424_v9, %v423_v8 }
 0x1a9   : > { %445 = vadd.xlane.f32.xlu0 %v444_v12 }
 0x1aa   : > { %v426_v13 = vrot.slane %v425_v11, 1 }
 0x1ac   : > { %v427_v15 = vadd.f32 %v426_v13, %v425_v11 }
 0x1ae   : > { %v428_v16 = vadd.f32 %v427_v15, %v420_v14 }
 0x1b0   : > { %1057 = vlog2.f32 %v428_v16 }
 0x1bd   : > { %v1058_v17 = vpop.eup %1057 }
 0x1be   : > { %v430_v18 = vmul.f32 0.6931472, %v1058_v17 }
 0x1c0   : > { %v432_v19 = vsel %vm431_vm6, %v430_v18, 0.0 }
 0x1c1   : > { %433 = vadd.xlane.f32.xlu0 %v432_v19 }
 0x226   : > { %v412_v20 = vpop.xlane.xlu0 %411 }
 0x22a   : > { %v409_v21 = vpop.xlane.xlu0 %408 }
 0x22b   : > { %v413_v22 = vadd.f32 %v412_v20, %v409_v21 }
 0x22d   : > { %1059 = vlog2.f32 %v413_v22 }
 0x22e   : > { %v491_v23 = vpop.xlane.xlu0 %490 }
 0x22f   : > { %1061 = vlog2.f32 %v491_v23 }
 0x232   : > { %v446_v30 = vpop.xlane.xlu0 %445 }
 0x233   : > { %v465_v34 = vsel %vm449_vm7, %v446_v30, 0.0 }
 0x23a   : > { %v1060_v25 = vpop.eup %1059 }
 0x23b   : > { %v448_v27 = vmul.f32 0.6931472, %v1060_v25 }
 0x23c   : > { %v1062_v24 = vpop.eup %1061 }
 0x23d   : > { %v493_v28 = vmul.f32 0.6931472, %v1062_v24  ;;  %v450_v29 = vsel %vm449_vm7, %v448_v27, 0.0 }
 0x23e   : > { %451 = vadd.xlane.f32.xlu0 %v450_v29 }
 0x23f   : > { %v494_v32 = vadd.f32 %v493_v28, %v1277_v26 }
 0x241   : > { %v505_v33 = vsub.f32 %v494_v32, %v504_v31 }
 0x242   : > { %466 = vadd.xlane.f32.xlu0 %v465_v34 }
 0x243   : > { %v506_v35 = vsel %vm449_vm7, %v505_v33, 0.0 }
 0x246   : > { %507 = vadd.xlane.f32.xlu0 %v506_v35 }
 0x24a   : > { %v434_v36 = vpop.xlane.xlu0 %433 }
 0x24b   : > { %v435_v37 = vrot.slane %v434_v36, 4 }
 0x24d   : > { %v436_v38 = vadd.f32 %v435_v37, %v434_v36 }
 0x24f   : > { %v437_v39 = vrot.slane %v436_v38, 2 }
 0x251   : > { %v438_v40 = vadd.f32 %v437_v39, %v436_v38 }
 0x253   : > { %v439_v41 = vrot.slane %v438_v40, 1 }
 0x255   : > { %v440_v42 = vadd.f32 %v439_v41, %v438_v40 }
 0x257   : > { %983 = vpush %v440_v42 }
 0x288   : > { %s984_s26 = spop %983 }
 0x2c7   : > { %v452_v43 = vpop.xlane.xlu0 %451 }
 0x2c8   : > { %v453_v44 = vrot.slane %v452_v43, 4 }
 0x2ca   : > { %v454_v45 = vadd.f32 %v453_v44, %v452_v43 }
 0x2cb   : > { %v467_v46 = vpop.xlane.xlu0 %466 }
 0x2cc   : > { %v455_v47 = vrot.slane %v454_v45, 2  ;;  %v468_v48 = vrot.slane %v467_v46, 4 }
 0x2ce   : > { %v469_v26 = vadd.f32 %v468_v48, %v467_v46  ;;  %v456_v49 = vadd.f32 %v455_v47, %v454_v45 }
 0x2cf   : > { %v508_v50 = vpop.xlane.xlu0 %507 }
 0x2d0   : > { %v470_v51 = vrot.slane %v469_v26, 2  ;;  %v509_v52 = vrot.slane %v508_v50, 4  ;;  %v457_v53 = vrot.slane %v456_v49, 1 }
 0x2d2   : > { %v510_v54 = vadd.f32 %v509_v52, %v508_v50  ;;  %v458_v55 = vadd.f32 %v457_v53, %v456_v49  ;;  %v471_v56 = vadd.f32 %v470_v51, %v469_v26 }
 0x2d4   : > { %v511_v57 = vrot.slane %v510_v54, 2  ;;  %985 = vpush %v458_v55  ;;  %v472_v58 = vrot.slane %v471_v56, 1 }
 0x2d6   : > { %v512_v59 = vadd.f32 %v511_v57, %v510_v54  ;;  %v473_v60 = vadd.f32 %v472_v58, %v471_v56 }
 0x2d8   : > { %987 = vpush %v473_v60  ;;  %v513_v61 = vrot.slane %v512_v59, 1 }
 0x2da   : > { %v514_v62 = vadd.f32 %v513_v61, %v512_v59 }
 0x2dc   : > { %989 = vpush %v514_v62 }
 0x305   : > { %s986_s6 = spop %985 }
 0x306   : > { %s460_s7 = sadd.f32 %s986_s6, %s984_s26 }
 0x308   : > { %s463_s8 = smul.f32 0.0625, %s460_s7 }
 0x309   : > { %s988_s9 = spop %987 }
 0x30a   : > { %s477_s10 = smul.f32 0.125, %s988_s9  ;;  %s464_s12 = sadd.f32 2.0, %s463_s8 }
 0x30c   : > { %s478_s13 = smul.f32 2.0, %s477_s10 }
 0x30d   : > { %s990_s16 = spop %989 }
 0x30e   : > { %s479_s17 = ssub.f32 %s464_s12, %s478_s13  ;;  %s518_s23 = smul.f32 0.125, %s990_s16 }
 0x310   : > { %v520_v63 = vstv %s479_s17  ;;  %v523_v2 = vstv %s518_s23 }
 0x311   : > { %v521_v3 = vsel %vm519_vm8, %v520_v63, 0.0  ;;  %v524_v4 = vsel %vm522_vm9, %v523_v2, 0.0 }
 0x312   : > { %v525_v5 = vadd.f32 %v524_v4, %v521_v3 }
 0x314   : > { %526 = vst [vmem:[%s1253_s15] sm:$0xff] %v525_v5 }
 0x315 PF: > { %p924_p12 = scmp.ne.s32.totalorder %s1208_s22, 1 }
 0x317   : > { %530 = sbr.rel (%p924_p12) target bundleno = 1559 (0x617), region = 48 }
 0x31c   : > { %v531_v6 = vld [vmem:[%s1246_s11] sm:$0xff]  ;;  %vm534_vm10 = vcmask 261120   ;;  %v1154_v12 = vmov 0.0   ;;  %vm1155_vm11 = vmmov 0   ;;  %vm769_vm12 = vcmask 31744   ;;  %v768_v14 = vld [vmem:[%s1377_s4 + $0x8] sm:$0xff] }
 0x31d   : > { %v532_v7 = vld [vmem:[%s1251_s14] sm:$0xff]  ;;  %v533_v8 = vmul.f32 %v531_v6, %v531_v6  ;;  %965 = vmatprep.subr.bf16.mxu0 %v1154_v12  ;;  %971 = vmatprep.subr.bf16.mxu1 %v1154_v12  ;;  %v773_v16 = vsel %vm769_vm12, %v768_v14, -inf  ;;  %v689_v57 = vshrl.u32 %v238_v0, 7  ;;  %vm693_vm14 = vcmask 64512  }
 0x31e   : > { %v541_v9 = vmul.f32 %v532_v7, %v532_v7  ;;  %967 = vmatprep.mubr.msk.bf16.mxu0 %vm1155_vm11, %v1154_v12  ;;  %973 = vmatprep.mubr.msk.bf16.mxu1 %vm1155_vm11, %v1154_v12  ;;  %v767_v13 = vld [vmem:[%s1377_s4] sm:$0xff]  ;;  %vm718_vm15 = vcmask 57344   ;;  %vm736_vm0 = vcmask 7168   ;;  %vm816_vm1 = vcmp.eq.s32.totalorder %v1240_v1, 0 }
 0x31f   : > { %v535_v10 = vsel %vm534_vm10, %v533_v8, 0.0  ;;  %v770_v15 = vsel %vm769_vm12, %v767_v13, -inf  ;;  %vm690_vm13 = vcmp.ne.s32.totalorder %v689_v57, %v1240_v1  ;;  %vm819_vm2 = vcmp.eq.s32.totalorder %v1240_v1, 2 }
 0x320   : > { %536 = vadd.xlane.f32.xlu0 %v535_v10  ;;  %v542_v11 = vsel %vm534_vm10, %v541_v9, 0.0  ;;  %771 = vmax.xlane.f32.xlu1 %v770_v15 }
 0x324   : > { %543 = vadd.xlane.f32.xlu0 %v542_v11  ;;  %774 = vmax.xlane.f32.xlu1 %v773_v16 }
 0x3a9   : > { %v537_v17 = vpop.xlane.xlu0 %536  ;;  %v772_v31 = vpop.xlane.xlu1 %771 }
 0x3aa   : > { %v538_v18 = vmax.f32 %v537_v17, 1e-24  ;;  %v1312_v34 = vsub.f32 %v767_v13, %v772_v31 }
 0x3ac   : > { %1063 = vrsqrt.f32 %v538_v18  ;;  %v778_v41 = vmul.f32 1.442695, %v1312_v34 }
 0x3ad   : > { %v544_v19 = vpop.xlane.xlu0 %543  ;;  %v775_v32 = vpop.xlane.xlu1 %774 }
 0x3ae   : > { %v545_v20 = vmax.f32 %v544_v19, 1e-24  ;;  %v1314_v37 = vsub.f32 %v768_v14, %v775_v32 }
 0x3b0   : > { %1065 = vrsqrt.f32 %v545_v20  ;;  %v780_v46 = vmul.f32 1.442695, %v1314_v37 }
 0x3b9   : > { %v1064_v21 = vpop.eup %1063 }
 0x3ba   : > { %v540_v22 = vmul.f32 %v1064_v21, %v531_v6 }
 0x3bc   : > { %v548_v23 = vpack.c.bf16 %v540_v22, %v540_v22 }
 0x3bd   : > { %v1066_v25 = vpop.eup %1065 }
 0x3be   : > { %v551_v27 = vsel %vm534_vm10, %v548_v23, 0  ;;  %v547_v24 = vmul.f32 %v1066_v25, %v532_v7 }
 0x3bf   : > { %966 = vmatpush3.bf16.xpose.msra.mxu0 %v551_v27 }
 0x3c0   : > { %v549_v28 = vpack.c.bf16 %v547_v24, %v547_v24  ;;  %977 = vmatprep.subr.bf16.mxu0 %v1154_v12  ;;  %v730_v29 = vmul.f32 %v547_v24, %v540_v22 }
 0x3c2   : > { %v598_v30 = vsel %vm534_vm10, %v549_v28, 0  ;;  %v731_v10 = vsel %vm534_vm10, %v730_v29, 0.0 }
 0x3c3   : > { %972 = vmatpush3.bf16.xpose.msra.mxu1 %v598_v30 }
 0x3c6   : > { %968 = vmatmul.mubr.msk.bf16.vlgmr.msra.gmra.mxu0 %vm534_vm10, %v548_v23 }
 0x3c7   : > { %978 = vmatpush3.bf16.xpose.msra.mxu0 %v598_v30  ;;  %979 = vmatprep.mubr.msk.bf16.mxu0 %vm1155_vm11, %v1154_v12 }
 0x3ca   : > { %974 = vmatmul.mubr.msk.bf16.vlgmr.msra.gmra.mxu1 %vm534_vm10, %v548_v23 }
 0x3ce   : > { %980 = vmatmul.mubr.msk.bf16.vlgmr.msra.gmra.mxu0 %vm534_vm10, %v549_v28 }
 0x486   : > { %v587_v33 = vpop.f32.mrf.mxu0 }
 0x487   : > { %v926_v35 = vadd.f32 -1.0, %v587_v33 }
 0x488   : > { %v969_v36 = vpop.f32.mrf.mxu0 }
 0x489   : > { %v594_v38 = vmul.f32 2.0, %v926_v35 }
 0x48a   : > { %v590_v39 = vpop.f32.mrf.mxu0  ;;  %v634_v40 = vpop.f32.mrf.mxu1 }
 0x48b   : > { %v595_v42 = vmul.f32 1.442695, %v594_v38  ;;  %v928_v43 = vadd.f32 -1.0, %v634_v40 }
 0x48c   : > { %v970_v44 = vpop.f32.mrf.mxu0  ;;  %v975_v45 = vpop.f32.mrf.mxu1 }
 0x48d   : > { %1067 = vpow2.f32 %v595_v42  ;;  %v641_v47 = vmul.f32 2.0, %v928_v43 }
 0x48e   : > { %1069 = vpow2.f32 %v778_v41  ;;  %v637_v48 = vpop.f32.mrf.mxu1  ;;  %v678_v26 = vpop.f32.mrf.mxu0 }
 0x48f   : > { %v642_v49 = vmul.f32 1.442695, %v641_v47  ;;  %v930_v50 = vadd.f32 -1.0, %v678_v26  ;;  %1071 = vpow2.f32 %v780_v46 }
 0x490   : > { %v976_v51 = vpop.f32.mrf.mxu1  ;;  %v981_v52 = vpop.f32.mrf.mxu0 }
 0x491   : > { %1073 = vpow2.f32 %v642_v49  ;;  %v685_v53 = vmul.f32 2.0, %v930_v50 }
 0x492   : > { %v681_v54 = vpop.f32.mrf.mxu0 }
 0x493   : > { %v686_v55 = vmul.f32 1.442695, %v685_v53 }
 0x494   : > { %v982_v56 = vpop.f32.mrf.mxu0 }
 0x495   : > { %1075 = vpow2.f32 %v686_v55 }
 0x49a   : > { %v1068_v58 = vpop.eup %1067 }
 0x49b   : > { %v1070_v59 = vpop.eup %1069  ;;  %v691_v60 = vsel %vm690_vm13, %v1068_v58, 0.0 }
 0x49c   : > { %v694_v61 = vsel %vm693_vm14, %v691_v60, 0.0  ;;  %v1072_v62 = vpop.eup %1071  ;;  %v782_v2 = vsel %vm769_vm12, %v1070_v59, 0.0 }
 0x49d   : > { %695 = vadd.xlane.f32.xlu0 %v694_v61  ;;  %v785_v4 = vsel %vm769_vm12, %v1072_v62, 0.0 }
 0x49e   : > { %v1074_v63 = vpop.eup %1073 }
 0x49f   : > { %v697_v3 = vsel %vm693_vm14, %v1074_v63, 0.0 }
 0x4a0   : > { %698 = vadd.xlane.f32.xlu1 %v697_v3  ;;  %v702_v0 = vrot.slane %v697_v3, 4 }
 0x4a1   : > { %783 = vadd.xlane.f32.xlu0 %v782_v2 }
 0x4a2   : > { %v1076_v5 = vpop.eup %1075  ;;  %v703_v6 = vadd.f32 %v702_v0, %v697_v3 }
 0x4a3   : > { %v692_v7 = vsel %vm690_vm13, %v1076_v5, 0.0 }
 0x4a4   : > { %v708_v8 = vsel %vm693_vm14, %v692_v7, 0.0  ;;  %v704_v9 = vrot.slane %v703_v6, 2  ;;  %786 = vadd.xlane.f32.xlu1 %v785_v4 }
 0x4a5   : > { %v709_v11 = vrot.slane %v708_v8, 4  ;;  %732 = vadd.xlane.f32.xlu0 %v731_v10 }
 0x4a6   : > { %v705_v13 = vadd.f32 %v704_v9, %v703_v6 }
 0x4a7   : > { %v710_v12 = vadd.f32 %v709_v11, %v708_v8 }
 0x4a8   : > { %v706_v16 = vrot.slane %v705_v13, 1 }
 0x4a9   : > { %v711_v14 = vrot.slane %v710_v12, 2 }
 0x4aa   : > { %v707_v18 = vadd.f32 %v706_v16, %v705_v13 }
 0x4ab   : > { %v712_v15 = vadd.f32 %v711_v14, %v710_v12 }
 0x4ad   : > { %v713_v17 = vrot.slane %v712_v15, 1 }
 0x4af   : > { %v714_v19 = vadd.f32 %v713_v17, %v712_v15 }
 0x4b1   : > { %v715_v20 = vadd.f32 %v714_v19, %v707_v18 }
 0x4b3   : > { %1077 = vlog2.f32 %v715_v20 }
 0x4c0   : > { %v1078_v21 = vpop.eup %1077 }
 0x4c1   : > { %v717_v22 = vmul.f32 0.6931472, %v1078_v21 }
 0x4c3   : > { %v719_v23 = vsel %vm718_vm15, %v717_v22, 0.0 }
 0x4c4   : > { %720 = vadd.xlane.f32.xlu1 %v719_v23 }
 0x526   : > { %v696_v25 = vpop.xlane.xlu0 %695 }
 0x529   : > { %v699_v27 = vpop.xlane.xlu1 %698 }
 0x52a   : > { %v700_v24 = vadd.f32 %v699_v27, %v696_v25  ;;  %v784_v28 = vpop.xlane.xlu0 %783 }
 0x52b   : > { %1079 = vrcp.f32 %v784_v28 }
 0x52c   : > { %1081 = vlog2.f32 %v700_v24 }
 0x52d   : > { %1083 = vlog2.f32 %v784_v28  ;;  %v787_v29 = vpop.xlane.xlu1 %786 }
 0x52e   : > { %1085 = vrcp.f32 %v787_v29  ;;  %v733_v30 = vpop.xlane.xlu0 %732 }
 0x52f   : > { %1087 = vlog2.f32 %v787_v29  ;;  %v752_v31 = vsel %vm736_vm0, %v733_v30, 0.0 }
 0x530   : > { %753 = vadd.xlane.f32.xlu1 %v752_v31 }
 0x538   : > { %v1080_v32 = vpop.eup %1079 }
 0x539   : > { %v1082_v33 = vpop.eup %1081  ;;  %v789_v43 = vmul.f32 %v1080_v32, %v1070_v59 }
 0x53a   : > { %v1084_v35 = vpop.eup %1083  ;;  %v735_v36 = vmul.f32 0.6931472, %v1082_v33 }
 0x53b   : > { %v1086_v38 = vpop.eup %1085  ;;  %v793_v39 = vmul.f32 0.6931472, %v1084_v35 }
 0x53c   : > { %v1088_v40 = vpop.eup %1087  ;;  %v737_v41 = vsel %vm736_vm0, %v735_v36, 0.0  ;;  %v791_v45 = vmul.f32 %v1086_v38, %v1072_v62 }
 0x53d   : > { %v795_v42 = vmul.f32 0.6931472, %v1088_v40  ;;  %738 = vadd.xlane.f32.xlu0 %v737_v41  ;;  %v796_v44 = vsub.f32 %v1312_v34, %v793_v39 }
 0x53f   : > { %v797_v46 = vsub.f32 %v1314_v37, %v795_v42  ;;  %v798_v47 = vmul.f32 %v796_v44, %v789_v43 }
 0x541   : > { %v799_v48 = vmul.f32 %v797_v46, %v791_v45  ;;  %v800_v26 = vsel %vm769_vm12, %v798_v47, 0.0 }
 0x543   : > { %v801_v49 = vsel %vm769_vm12, %v799_v48, 0.0 }
 0x544   : > { %v802_v50 = vadd.f32 %v801_v49, %v800_v26 }
 0x546   : > { %803 = vadd.xlane.f32.xlu0 %v802_v50 }
 0x54d   : > { %v721_v51 = vpop.xlane.xlu1 %720 }
 0x54e   : > { %v722_v52 = vrot.slane %v721_v51, 4 }
 0x550   : > { %v723_v53 = vadd.f32 %v722_v52, %v721_v51 }
 0x552   : > { %v724_v54 = vrot.slane %v723_v53, 2 }
 0x554   : > { %v725_v55 = vadd.f32 %v724_v54, %v723_v53 }
 0x556   : > { %v726_v56 = vrot.slane %v725_v55, 1 }
 0x558   : > { %v727_v57 = vadd.f32 %v726_v56, %v725_v55 }
 0x55a   : > { %991 = vpush %v727_v57 }
 0x58b   : > { %s992_s6 = spop %991 }
 0x5b9   : > { %v754_v34 = vpop.xlane.xlu1 %753 }
 0x5ba   : > { %v755_v58 = vrot.slane %v754_v34, 4 }
 0x5bc   : > { %v756_v59 = vadd.f32 %v755_v58, %v754_v34 }
 0x5be   : > { %v757_v37 = vrot.slane %v756_v59, 2 }
 0x5c0   : > { %v758_v63 = vadd.f32 %v757_v37, %v756_v59 }
 0x5c2   : > { %v759_v0 = vrot.slane %v758_v63, 1 }
 0x5c4   : > { %v760_v9 = vadd.f32 %v759_v0, %v758_v63 }
 0x5c6   : > { %v739_v60 = vpop.xlane.xlu0 %738 }
 0x5c7   : > { %v740_v61 = vrot.slane %v739_v60, 4 }
 0x5c9   : > { %v741_v62 = vadd.f32 %v740_v61, %v739_v60 }
 0x5cb   : > { %v742_v2 = vrot.slane %v741_v62, 2 }
 0x5cd   : > { %v743_v3 = vadd.f32 %v742_v2, %v741_v62 }
 0x5cf   : > { %v804_v4 = vpop.xlane.xlu0 %803  ;;  %v744_v5 = vrot.slane %v743_v3, 1 }
 0x5d0   : > { %v805_v6 = vrot.slane %v804_v4, 4 }
 0x5d1   : > { %v745_v7 = vadd.f32 %v744_v5, %v743_v3 }
 0x5d2   : > { %v806_v8 = vadd.f32 %v805_v6, %v804_v4 }
 0x5d3   : > { %993 = vpush %v745_v7 }
 0x5d4   : > { %v807_v10 = vrot.slane %v806_v8, 2  ;;  %995 = vpush %v760_v9 }
 0x5d6   : > { %v808_v11 = vadd.f32 %v807_v10, %v806_v8 }
 0x5d8   : > { %v809_v12 = vrot.slane %v808_v11, 1 }
 0x5da   : > { %v810_v13 = vadd.f32 %v809_v12, %v808_v11 }
 0x5dc   : > { %997 = vpush %v810_v13 }
 0x604   : > { %s994_s7 = spop %993 }
 0x605   : > { %s747_s8 = sadd.f32 %s994_s7, %s992_s6  ;;  %s996_s9 = spop %995 }
 0x606   : > { %s764_s10 = smul.f32 0.125, %s996_s9 }
 0x607   : > { %s750_s12 = smul.f32 0.0625, %s747_s8 }
 0x608   : > { %s765_s16 = smul.f32 2.0, %s764_s10 }
 0x609   : > { %s751_s13 = sadd.f32 2.0, %s750_s12 }
 0x60b   : > { %s766_s17 = ssub.f32 %s751_s13, %s765_s16 }
 0x60d   : > { %s998_s23 = spop %997  ;;  %v817_v14 = vstv %s766_s17 }
 0x60e   : > { %s812_s25 = ssub.f32 0.0, %s998_s23  ;;  %v818_v16 = vsel %vm816_vm1, %v817_v14, 0.0 }
 0x610   : > { %s815_s11 = smul.f32 0.0625, %s812_s25 }
 0x612   : > { %v820_v15 = vstv %s815_s11 }
 0x613   : > { %v821_v17 = vsel %vm819_vm2, %v820_v15, 0.0 }
 0x614   : > { %v822_v18 = vadd.f32 %v821_v17, %v818_v16 }
 0x616   : > { %823 = vst [vmem:[%s1253_s15] sm:$0xff] %v822_v18 }
 0x617 PF: > { %s932_s14 = sshll.u32 %s1208_s22, 7  ;;  %s838_s8 = sshll.u32 %s1253_s15, 4  ;;  %s839_s8 = int_to_ptr.vmem [resolvable:$true] %s838_s8 }
 0x618   : > { %s836_s7 = scalar_lea.hbm %s1378_s5, %s932_s14  ;;  %s825_s9 = scalar_lea.sflag [#allocation3], %s226_s30 }
 0x619   : > { %s1089_s10 = scalar_lea.vmem %s839_s8, 128  ;;  %s1156_s12 = smov [#allocation2]  }
 0x61a   : > { %p1090_p13 = scmp.ne.s32.totalorder %s839_s8, %s1089_s10  ;;  %s1093_s13 = sshll.u32 %s1156_s12, 4  ;;  %s1094_s13 = int_to_ptr.vmem [resolvable:$false] %s1093_s13 }
 0x61b   : > { %s1095_s16 = scalar_lea.vmem %s1094_s13, 256  ;;  %p1096_p2 = scmp.lt.s32.totalorder %s839_s8, %s1094_s13 }
 0x61c   : > { %p1091_p0 = pnand %p1090_p13, %p1225_p5  ;;  %p1097_p3 = scmp.lt.s32.totalorder %s1095_s16, %s1089_s10 }
 0x61e   : > { %p1092_p1 = pneg %p1091_p0  ;;  %p1098_p4 = por %p1097_p3, %p1096_p2 }
 0x620   : > { %p1099_p7 = pnand %p1098_p4, %p1092_p1 }
 0x622   : > { %1102 = shalt.err (!%p1099_p7)
}
 0x623   : > { %s1103_s22 = scalar_lea.hbm %s836_s7, 128  ;;  %s1107_s17 = scalar_lea.hbm %s1378_s5, 256 }
 0x624   : > { %p1104_p8 = scmp.ne.s32.totalorder %s836_s7, %s1103_s22  ;;  %p1108_p11 = scmp.lt.s32.totalorder %s836_s7, %s1378_s5 }
 0x625   : > { %p1109_p12 = scmp.lt.s32.totalorder %s1107_s17, %s1103_s22 }
 0x626   : > { %p1105_p9 = pnand %p1104_p8, %p1225_p5 }
 0x627   : > { %p1110_p13 = por %p1109_p12, %p1108_p11 }
 0x628   : > { %p1106_p10 = pneg %p1105_p9 }
 0x62a   : > { %p1111_p0 = pnand %p1110_p13, %p1106_p10 }
 0x62c   : > { %1114 = shalt.err (!%p1111_p0)
}
 0x62d   : > { %999 = dma.vmem_to_hbm [thread:$0]  (%p1225_p5), %s839_s8, 128, %s836_s7, %s825_s9  }
 0x62e PF: > { %p1005_p1 = scmp.ge.s32.totalorder %s1149_s21, 2  ;;  %s850_s11 = sand.u32 1, %s1137_s18  }
 0x62f   : > { %s851_s14 = scalar_lea.sflag [#allocation3], %s850_s11 }
 0x630   : > { %p1002_p2 = pnand %p1005_p1, %p1229_p6 }
 0x632   : > { %p1003_p3 = pneg %p1002_p2 }
 0x634   : > { %1132 = dma.done.wait (%p1003_p3), %s851_s14, 128  }
 0x635   : > { %1134 = vsyncadd (%p1003_p3), %s851_s14, 4294967168  ;;  %p15_p4 = scmp.ge.s32.totalorder %s1212_s24, 4   ;;  %s1381_s18 = smov %s1141_s19 }
 0x636   : > { %s1382_s19 = smov %s1145_s20  ;;  %s1383_s20 = smov %s1223_s27 }
 0x637   : > { %s1384_s21 = smov %s1212_s24  ;;  %17 = sbr.rel (!%p15_p4) target bundleno = 3 (0x3), region = 86 }
 0x63c   :  { %856 = vsyncpa [#allocation3], 1 }
 0x63d   :  { %858 = vsyncpa [#allocation3 + $0x1], 1 }

</bundles_post_ra>
